<compile_context>
chip_gen: v7x
topology: tpu7x:2x2x1
jax: 0.10.0
libtpu: 0.0.40
codegen_flags: <defaults>
</compile_context>

<pallas_src>
import functools

import jax
import jax.numpy as jnp
from jax import lax
from jax.experimental import pallas as pl
from jax.experimental.pallas import tpu as pltpu


def _round_up(x, m):
    return (x + m - 1) // m * m


# ---------------------------------------------------------------------------
# Pallas kernel: 3x3 conv as 9 tap-shifted GEMMs + bias + ReLU, single store.
# ---------------------------------------------------------------------------
def _conv3x3_tap_kernel(x_ref, w_ref, b_ref, o_ref, *, offsets, tm, halo):
    i = pl.program_id(0)
    base = pl.multiple_of(i * tm, tm)
    # One aligned VMEM read of the rows this block needs (tm output rows + tap
    # halo). Tap shifts become cheap static in-register slices (f32 so the
    # sublane shift never touches packed bf16 rows); values are re-cast to bf16
    # so the MXU still sees bf16 x bf16 with f32 accumulation.
    window = x_ref[pl.ds(base, tm + halo), :].astype(jnp.float32)

    acc = None
    for t, off in enumerate(offsets):
        a_t = window[off:off + tm, :].astype(jnp.bfloat16)
        p = jnp.dot(a_t, w_ref[t], preferred_element_type=jnp.float32)
        acc = p if acc is None else acc + p

    y = acc + b_ref[...]
    o_ref[...] = jnp.maximum(y, 0.0).astype(o_ref.dtype)


def _conv3x3_tap_gemm(xp, w9, bias, out_dtype, tm=128):
    """3x3 stride-1 'valid' conv over an already zero-padded NHWC input.

    xp   : (Nb, Hp, Wp, Cp) bf16, spatially zero-padded, channels padded to Cp.
    w9   : (9, Cp, Cop) bf16 weight, tap order (kh, kw), Cop = Cout padded to 128.
    bias : (Co,) f32 (unpadded -> Co is recovered statically from its shape).
    Returns (Nb, Hp-2, Wp-2, Co) in out_dtype.

    Trick: enumerate output rows over the full padded grid (Nb*Hp*Wp).  For the
    flattened activation, tap (kh, kw) of output row m is simply row
    m + kh*Wp + kw, so each tap is a contiguous shifted window of the SAME
    array (no im2col).  Seam rows (wp >= Wo or hp >= Ho) compute garbage and
    are cropped afterwards.
    """
    Nb, Hp, Wp, Cp = xp.shape
    assert w9.shape[0] == 9 and w9.shape[1] == Cp
    Cop = w9.shape[2]
    Co = bias.shape[0]
    Ho, Wo = Hp - 2, Wp - 2

    R = Nb * Hp * Wp
    Mp = _round_up(R, 2 * tm)            # even #blocks -> balanced across 2 TCs
    halo = _round_up(2 * Wp + 2, 16)     # max tap offset, 16-row aligned (bf16)
    Rp = Mp + halo
    offsets = tuple(kh * Wp + kw for kh in range(3) for kw in range(3))

    x_flat = jnp.pad(xp.reshape(R, Cp), ((0, Rp - R), (0, 0)))
    b_row = jnp.pad(bias.astype(jnp.float32), (0, Cop - Co)).reshape(1, Cop)

    kernel = functools.partial(_conv3x3_tap_kernel,
                               offsets=offsets, tm=tm, halo=halo)
    out = pl.pallas_call(
        kernel,
        out_shape=jax.ShapeDtypeStruct((Mp, Cop), out_dtype),
        grid_spec=pltpu.PrefetchScalarGridSpec(
            num_scalar_prefetch=0,
            grid=(Mp // tm,),
            in_specs=[
                pl.BlockSpec((Rp, Cp), lambda i: (0, 0)),        # resident activation
                pl.BlockSpec((9, Cp, Cop), lambda i: (0, 0, 0)),  # resident weights
                pl.BlockSpec((1, Cop), lambda i: (0, 0)),        # resident bias
            ],
            out_specs=pl.BlockSpec((tm, Cop), lambda i: (i, 0)),
        ),
        compiler_params=pltpu.CompilerParams(
            dimension_semantics=("parallel",),
            vmem_limit_bytes=32 * 1024 * 1024,
        ),
    )(x_flat, w9, b_row)

    return out[:R, :Co].reshape(Nb, Hp, Wp, Co)[:, :Ho, :Wo, :]


# ---------------------------------------------------------------------------
# Conv glue (bf16, single lax.pad per layer) around the Pallas kernel.
# ---------------------------------------------------------------------------
def conv3x3_relu(x, wp):
    """Conv2d(3x3, padding=1) + ReLU, NHWC bf16 in -> NHWC bf16 out."""
    C = x.shape[-1]
    Cp = wp["w"].shape[1]
    zero = jnp.zeros((), x.dtype)
    xp = lax.pad(x, zero, ((0, 0, 0), (1, 1, 0), (1, 1, 0), (0, Cp - C, 0)))
    return _conv3x3_tap_gemm(xp, wp["w"], wp["b"], jnp.bfloat16)


def conv_transpose3x3_s2_relu(x, wp):
    """ConvTranspose2d(3x3, stride=2, padding=1, output_padding=1) + ReLU, NHWC.

    Exact lowering: interior-dilate by 1 and pad (1 front / 2 back) with a single
    lax.pad, then a regular 3x3 stride-1 conv with the spatially flipped /
    (cin,cout)-transposed weight.  Output is f32 (module boundary).
    """
    C = x.shape[-1]
    Cp = wp["w"].shape[1]
    zero = jnp.zeros((), x.dtype)
    xp = lax.pad(x, zero, ((0, 0, 0), (1, 2, 1), (1, 2, 1), (0, Cp - C, 0)))
    return _conv3x3_tap_gemm(xp, wp["w"], wp["b"], jnp.float32)


# ---------------------------------------------------------------------------
# Weight prep (once at init: reshape to 9 taps, pad channels, bf16 cast).
# ---------------------------------------------------------------------------
def _prep_weight(w_hwio):
    """(3, 3, Cin, Cout) f32 -> (9, Cp, Cop) bf16 with Cp=ceil16(Cin), Cop=ceil128(Cout)."""
    Cin, Cout = int(w_hwio.shape[2]), int(w_hwio.shape[3])
    Cp = _round_up(Cin, 16)
    Cop = _round_up(Cout, 128)
    w9 = w_hwio.reshape(9, Cin, Cout)
    return jnp.pad(w9, ((0, 0), (0, Cp - Cin), (0, Cop - Cout))).astype(jnp.bfloat16)


def init_decoder_block(key, in_ch, mid_ch, out_ch):
    k1, k2, k3, k4 = jax.random.split(key, 4)

    # Conv2d(in_ch, mid_ch, 3, padding=1), stored as (kh, kw, cin, cout).
    bound1 = 1.0 / float(in_ch * 9) ** 0.5
    w1 = jax.random.uniform(k1, (3, 3, in_ch, mid_ch), jnp.float32, -bound1, bound1)
    b1 = jax.random.uniform(k2, (mid_ch,), jnp.float32, -bound1, bound1)

    # ConvTranspose2d(mid_ch, out_ch, 3, stride=2, padding=1, output_padding=1);
    # PyTorch weight layout (cin, cout, kh, kw).
    bound2 = 1.0 / float(out_ch * 9) ** 0.5
    wt = jax.random.uniform(k3, (mid_ch, out_ch, 3, 3), jnp.float32, -bound2, bound2)
    b2 = jax.random.uniform(k4, (out_ch,), jnp.float32, -bound2, bound2)

    # Equivalent regular-conv weight: flip spatial taps, move to (kh, kw, ci, co).
    w2c = jnp.transpose(wt[:, :, ::-1, ::-1], (2, 3, 0, 1))

    # NOTE: only arrays in this pytree (no Python scalars) so it jits cleanly.
    return {
        "conv": {"w": _prep_weight(w1), "b": b1},
        "deconv": {"w": _prep_weight(w2c), "b": b2},
        # Raw f32 weights kept only for the XLA reference check in __main__.
        "ref": {"w1": w1, "b1": b1, "w2c": w2c, "b2": b2},
    }


# ---------------------------------------------------------------------------
# Forward pass (DecoderBlock)
# ---------------------------------------------------------------------------
def decoder_block_forward(x_nchw, params):
    x = jnp.transpose(x_nchw, (0, 2, 3, 1)).astype(jnp.bfloat16)   # NCHW -> NHWC, bf16 early
    h = conv3x3_relu(x, params["conv"])                             # ConvRelu (bf16)
    y = conv_transpose3x3_s2_relu(h, params["deconv"])              # ConvT + ReLU (f32)
    return jnp.transpose(y, (0, 3, 1, 2))                           # NHWC -> NCHW


def decoder_block_reference(x_nchw, params):
    """Pure-XLA f32 reference (conv_general_dilated) for validation."""
    r = params["ref"]
    dn = ("NHWC", "HWIO", "NHWC")
    x = jnp.transpose(x_nchw, (0, 2, 3, 1))
    h = lax.conv_general_dilated(x, r["w1"], (1, 1), [(1, 1), (1, 1)],
                                 dimension_numbers=dn) + r["b1"]
    h = jnp.maximum(h, 0.0)
    y = lax.conv_general_dilated(h, r["w2c"], (1, 1), [(1, 2), (1, 2)],
                                 lhs_dilation=(2, 2), dimension_numbers=dn) + r["b2"]
    y = jnp.maximum(y, 0.0)
    return jnp.transpose(y, (0, 3, 1, 2))


if __name__ == "__main__":
    key = jax.random.PRNGKey(0)
    pkey, xkey = jax.random.split(key)

    in_ch, mid_ch, out_ch = 4, 16, 8
    params = init_decoder_block(pkey, in_ch, mid_ch, out_ch)
    x = jax.random.normal(xkey, (2, in_ch, 16, 16), jnp.float32)

    fwd = jax.jit(decoder_block_forward)
    out = jax.block_until_ready(fwd(x, params))

    assert out.shape == (2, out_ch, 32, 32), out.shape
    assert bool(jnp.all(jnp.isfinite(out)))

    ref = jax.block_until_ready(jax.jit(decoder_block_reference)(x, params))
    max_err = float(jnp.max(jnp.abs(out - ref)))
    assert max_err < 1e-1, f"max abs err vs reference: {max_err}"

    print("KERNEL_OK")
</pallas_src>

<mosaic_0001>
module attributes {stable_mosaic.version = 11 : i64} {
  func.func @_conv3x3_tap_kernel(%arg0: i32, %arg1: memref<816x16xbf16, #tpu.memory_space<vmem>>, %arg2: memref<9x16x128xbf16, #tpu.memory_space<vmem>>, %arg3: memref<1x128xf32, #tpu.memory_space<vmem>>, %arg4: memref<128x128xbf16, #tpu.memory_space<vmem>>) attributes {dimension_semantics = [#tpu.dimension_semantics<parallel>], iteration_bounds = array<i64: 6>, scalar_prefetch = 0 : i64, scratch_operands = 0 : i64, tpu.core_type = #tpu.core_type<tc>, window_params = [{pipeline_mode = #tpu.pipeline_mode<synchronous>, transform_indices = @transform_0, window_bounds = array<i64: 816, 16>}, {pipeline_mode = #tpu.pipeline_mode<synchronous>, transform_indices = @transform_1, window_bounds = array<i64: 9, 16, 128>}, {pipeline_mode = #tpu.pipeline_mode<synchronous>, transform_indices = @transform_2, window_bounds = array<i64: 1, 128>}, {transform_indices = @transform_3, window_bounds = array<i64: 128, 128>}]} {
    %c128_i32 = arith.constant 128 : i32
    %0 = arith.muli %arg0, %c128_i32 : i32
    %1 = tpu.assume_multiple %0, 128 : i32
    %2 = arith.index_cast %1 : i32 to index
    %c0 = arith.constant 0 : index
    %3 = vector.load %arg1[%2, %c0] : memref<816x16xbf16, #tpu.memory_space<vmem>>, vector<176x16xbf16>
    %4 = arith.extf %3 : vector<176x16xbf16> to vector<176x16xf32>
    %5 = vector.extract_strided_slice %4 {offsets = [0, 0], sizes = [128, 16], strides = [1, 1]} : vector<176x16xf32> to vector<128x16xf32>
    %6 = arith.truncf %5 : vector<128x16xf32> to vector<128x16xbf16>
    %c0_0 = arith.constant 0 : index
    %c0_1 = arith.constant 0 : index
    %c0_2 = arith.constant 0 : index
    %7 = vector.load %arg2[%c0_0, %c0_1, %c0_2] : memref<9x16x128xbf16, #tpu.memory_space<vmem>>, vector<1x16x128xbf16>
    %8 = vector.shape_cast %7 : vector<1x16x128xbf16> to vector<16x128xbf16>
    %cst = arith.constant dense<0.000000e+00> : vector<128x128xf32>
    %9 = tpu.matmul %6, %8, %cst {dimension_numbers = #tpu.dot_dimension_numbers<[1], [0], [0], [1], [0, 0, 1, 1], [], []>} : vector<128x16xbf16>, vector<16x128xbf16>, vector<128x128xf32> -> vector<128x128xf32>
    %10 = vector.extract_strided_slice %4 {offsets = [1, 0], sizes = [128, 16], strides = [1, 1]} : vector<176x16xf32> to vector<128x16xf32>
    %11 = arith.truncf %10 : vector<128x16xf32> to vector<128x16xbf16>
    %c1 = arith.constant 1 : index
    %c0_3 = arith.constant 0 : index
    %c0_4 = arith.constant 0 : index
    %12 = vector.load %arg2[%c1, %c0_3, %c0_4] : memref<9x16x128xbf16, #tpu.memory_space<vmem>>, vector<1x16x128xbf16>
    %13 = vector.shape_cast %12 : vector<1x16x128xbf16> to vector<16x128xbf16>
    %cst_5 = arith.constant dense<0.000000e+00> : vector<128x128xf32>
    %14 = tpu.matmul %11, %13, %cst_5 {dimension_numbers = #tpu.dot_dimension_numbers<[1], [0], [0], [1], [0, 0, 1, 1], [], []>} : vector<128x16xbf16>, vector<16x128xbf16>, vector<128x128xf32> -> vector<128x128xf32>
    %15 = arith.addf %9, %14 : vector<128x128xf32>
    %16 = vector.extract_strided_slice %4 {offsets = [2, 0], sizes = [128, 16], strides = [1, 1]} : vector<176x16xf32> to vector<128x16xf32>
    %17 = arith.truncf %16 : vector<128x16xf32> to vector<128x16xbf16>
    %c2 = arith.constant 2 : index
    %c0_6 = arith.constant 0 : index
    %c0_7 = arith.constant 0 : index
    %18 = vector.load %arg2[%c2, %c0_6, %c0_7] : memref<9x16x128xbf16, #tpu.memory_space<vmem>>, vector<1x16x128xbf16>
    %19 = vector.shape_cast %18 : vector<1x16x128xbf16> to vector<16x128xbf16>
    %cst_8 = arith.constant dense<0.000000e+00> : vector<128x128xf32>
    %20 = tpu.matmul %17, %19, %cst_8 {dimension_numbers = #tpu.dot_dimension_numbers<[1], [0], [0], [1], [0, 0, 1, 1], [], []>} : vector<128x16xbf16>, vector<16x128xbf16>, vector<128x128xf32> -> vector<128x128xf32>
    %21 = arith.addf %15, %20 : vector<128x128xf32>
    %22 = vector.extract_strided_slice %4 {offsets = [18, 0], sizes = [128, 16], strides = [1, 1]} : vector<176x16xf32> to vector<128x16xf32>
    %23 = arith.truncf %22 : vector<128x16xf32> to vector<128x16xbf16>
    %c3 = arith.constant 3 : index
    %c0_9 = arith.constant 0 : index
    %c0_10 = arith.constant 0 : index
    %24 = vector.load %arg2[%c3, %c0_9, %c0_10] : memref<9x16x128xbf16, #tpu.memory_space<vmem>>, vector<1x16x128xbf16>
    %25 = vector.shape_cast %24 : vector<1x16x128xbf16> to vector<16x128xbf16>
    %cst_11 = arith.constant dense<0.000000e+00> : vector<128x128xf32>
    %26 = tpu.matmul %23, %25, %cst_11 {dimension_numbers = #tpu.dot_dimension_numbers<[1], [0], [0], [1], [0, 0, 1, 1], [], []>} : vector<128x16xbf16>, vector<16x128xbf16>, vector<128x128xf32> -> vector<128x128xf32>
    %27 = arith.addf %21, %26 : vector<128x128xf32>
    %28 = vector.extract_strided_slice %4 {offsets = [19, 0], sizes = [128, 16], strides = [1, 1]} : vector<176x16xf32> to vector<128x16xf32>
    %29 = arith.truncf %28 : vector<128x16xf32> to vector<128x16xbf16>
    %c4 = arith.constant 4 : index
    %c0_12 = arith.constant 0 : index
    %c0_13 = arith.constant 0 : index
    %30 = vector.load %arg2[%c4, %c0_12, %c0_13] : memref<9x16x128xbf16, #tpu.memory_space<vmem>>, vector<1x16x128xbf16>
    %31 = vector.shape_cast %30 : vector<1x16x128xbf16> to vector<16x128xbf16>
    %cst_14 = arith.constant dense<0.000000e+00> : vector<128x128xf32>
    %32 = tpu.matmul %29, %31, %cst_14 {dimension_numbers = #tpu.dot_dimension_numbers<[1], [0], [0], [1], [0, 0, 1, 1], [], []>} : vector<128x16xbf16>, vector<16x128xbf16>, vector<128x128xf32> -> vector<128x128xf32>
    %33 = arith.addf %27, %32 : vector<128x128xf32>
    %34 = vector.extract_strided_slice %4 {offsets = [20, 0], sizes = [128, 16], strides = [1, 1]} : vector<176x16xf32> to vector<128x16xf32>
    %35 = arith.truncf %34 : vector<128x16xf32> to vector<128x16xbf16>
    %c5 = arith.constant 5 : index
    %c0_15 = arith.constant 0 : index
    %c0_16 = arith.constant 0 : index
    %36 = vector.load %arg2[%c5, %c0_15, %c0_16] : memref<9x16x128xbf16, #tpu.memory_space<vmem>>, vector<1x16x128xbf16>
    %37 = vector.shape_cast %36 : vector<1x16x128xbf16> to vector<16x128xbf16>
    %cst_17 = arith.constant dense<0.000000e+00> : vector<128x128xf32>
    %38 = tpu.matmul %35, %37, %cst_17 {dimension_numbers = #tpu.dot_dimension_numbers<[1], [0], [0], [1], [0, 0, 1, 1], [], []>} : vector<128x16xbf16>, vector<16x128xbf16>, vector<128x128xf32> -> vector<128x128xf32>
    %39 = arith.addf %33, %38 : vector<128x128xf32>
    %40 = vector.extract_strided_slice %4 {offsets = [36, 0], sizes = [128, 16], strides = [1, 1]} : vector<176x16xf32> to vector<128x16xf32>
    %41 = arith.truncf %40 : vector<128x16xf32> to vector<128x16xbf16>
    %c6 = arith.constant 6 : index
    %c0_18 = arith.constant 0 : index
    %c0_19 = arith.constant 0 : index
    %42 = vector.load %arg2[%c6, %c0_18, %c0_19] : memref<9x16x128xbf16, #tpu.memory_space<vmem>>, vector<1x16x128xbf16>
    %43 = vector.shape_cast %42 : vector<1x16x128xbf16> to vector<16x128xbf16>
    %cst_20 = arith.constant dense<0.000000e+00> : vector<128x128xf32>
    %44 = tpu.matmul %41, %43, %cst_20 {dimension_numbers = #tpu.dot_dimension_numbers<[1], [0], [0], [1], [0, 0, 1, 1], [], []>} : vector<128x16xbf16>, vector<16x128xbf16>, vector<128x128xf32> -> vector<128x128xf32>
    %45 = arith.addf %39, %44 : vector<128x128xf32>
    %46 = vector.extract_strided_slice %4 {offsets = [37, 0], sizes = [128, 16], strides = [1, 1]} : vector<176x16xf32> to vector<128x16xf32>
    %47 = arith.truncf %46 : vector<128x16xf32> to vector<128x16xbf16>
    %c7 = arith.constant 7 : index
    %c0_21 = arith.constant 0 : index
    %c0_22 = arith.constant 0 : index
    %48 = vector.load %arg2[%c7, %c0_21, %c0_22] : memref<9x16x128xbf16, #tpu.memory_space<vmem>>, vector<1x16x128xbf16>
    %49 = vector.shape_cast %48 : vector<1x16x128xbf16> to vector<16x128xbf16>
    %cst_23 = arith.constant dense<0.000000e+00> : vector<128x128xf32>
    %50 = tpu.matmul %47, %49, %cst_23 {dimension_numbers = #tpu.dot_dimension_numbers<[1], [0], [0], [1], [0, 0, 1, 1], [], []>} : vector<128x16xbf16>, vector<16x128xbf16>, vector<128x128xf32> -> vector<128x128xf32>
    %51 = arith.addf %45, %50 : vector<128x128xf32>
    %52 = vector.extract_strided_slice %4 {offsets = [38, 0], sizes = [128, 16], strides = [1, 1]} : vector<176x16xf32> to vector<128x16xf32>
    %53 = arith.truncf %52 : vector<128x16xf32> to vector<128x16xbf16>
    %c8 = arith.constant 8 : index
    %c0_24 = arith.constant 0 : index
    %c0_25 = arith.constant 0 : index
    %54 = vector.load %arg2[%c8, %c0_24, %c0_25] : memref<9x16x128xbf16, #tpu.memory_space<vmem>>, vector<1x16x128xbf16>
    %55 = vector.shape_cast %54 : vector<1x16x128xbf16> to vector<16x128xbf16>
    %cst_26 = arith.constant dense<0.000000e+00> : vector<128x128xf32>
    %56 = tpu.matmul %53, %55, %cst_26 {dimension_numbers = #tpu.dot_dimension_numbers<[1], [0], [0], [1], [0, 0, 1, 1], [], []>} : vector<128x16xbf16>, vector<16x128xbf16>, vector<128x128xf32> -> vector<128x128xf32>
    %57 = arith.addf %51, %56 : vector<128x128xf32>
    %c0_27 = arith.constant 0 : index
    %c0_28 = arith.constant 0 : index
    %58 = vector.load %arg3[%c0_27, %c0_28] : memref<1x128xf32, #tpu.memory_space<vmem>>, vector<1x128xf32>
    %59 = vector.broadcast %58 : vector<1x128xf32> to vector<128x128xf32>
    %60 = arith.addf %57, %59 : vector<128x128xf32>
    %cst_29 = arith.constant 0.000000e+00 : f32
    %61 = vector.broadcast %cst_29 : f32 to vector<128x128xf32>
    %62 = arith.maximumf %60, %61 : vector<128x128xf32>
    %63 = arith.truncf %62 : vector<128x128xf32> to vector<128x128xbf16>
    %c0_30 = arith.constant 0 : index
    %c0_31 = arith.constant 0 : index
    %64 = vector.load %arg4[%c0_30, %c0_31] : memref<128x128xbf16, #tpu.memory_space<vmem>>, vector<128x128xbf16>
    tpu.vector_store %arg4[%c0_30, %c0_31], %63 {strides = array<i32>} : memref<128x128xbf16, #tpu.memory_space<vmem>>, vector<128x128xbf16>,
    return
  }
  func.func @transform_0(%arg0: i32) -> (i32, i32) {
    %c0_i32 = arith.constant 0 : i32
    %c0_i32_0 = arith.constant 0 : i32
    %c0_i32_1 = arith.constant 0 : i32
    return %c0_i32, %c0_i32_0 : i32, i32
  }
  func.func @transform_1(%arg0: i32) -> (i32, i32, i32) {
    %c0_i32 = arith.constant 0 : i32
    %c0_i32_0 = arith.constant 0 : i32
    %c0_i32_1 = arith.constant 0 : i32
    %c0_i32_2 = arith.constant 0 : i32
    return %c0_i32, %c0_i32_0, %c0_i32_1 : i32, i32, i32
  }
  func.func @transform_2(%arg0: i32) -> (i32, i32) {
    %c0_i32 = arith.constant 0 : i32
    %c0_i32_0 = arith.constant 0 : i32
    %c0_i32_1 = arith.constant 0 : i32
    return %c0_i32, %c0_i32_0 : i32, i32
  }
  func.func @transform_3(%arg0: i32) -> (i32, i32) {
    %c0_i32 = arith.constant 0 : i32
    %c0_i32_0 = arith.constant 0 : i32
    return %arg0, %c0_i32 : i32, i32
  }
}

module attributes {stable_mosaic.version = 11 : i64} {
  func.func @_conv3x3_tap_kernel(%arg0: i32, %arg1: memref<2640x16xbf16, #tpu.memory_space<vmem>>, %arg2: memref<9x16x128xbf16, #tpu.memory_space<vmem>>, %arg3: memref<1x128xf32, #tpu.memory_space<vmem>>, %arg4: memref<128x128xf32, #tpu.memory_space<vmem>>) attributes {dimension_semantics = [#tpu.dimension_semantics<parallel>], iteration_bounds = array<i64: 20>, scalar_prefetch = 0 : i64, scratch_operands = 0 : i64, tpu.core_type = #tpu.core_type<tc>, window_params = [{pipeline_mode = #tpu.pipeline_mode<synchronous>, transform_indices = @transform_0, window_bounds = array<i64: 2640, 16>}, {pipeline_mode = #tpu.pipeline_mode<synchronous>, transform_indices = @transform_1, window_bounds = array<i64: 9, 16, 128>}, {pipeline_mode = #tpu.pipeline_mode<synchronous>, transform_indices = @transform_2, window_bounds = array<i64: 1, 128>}, {transform_indices = @transform_3, window_bounds = array<i64: 128, 128>}]} {
    %c128_i32 = arith.constant 128 : i32
    %0 = arith.muli %arg0, %c128_i32 : i32
    %1 = tpu.assume_multiple %0, 128 : i32
    %2 = arith.index_cast %1 : i32 to index
    %c0 = arith.constant 0 : index
    %3 = vector.load %arg1[%2, %c0] : memref<2640x16xbf16, #tpu.memory_space<vmem>>, vector<208x16xbf16>
    %4 = arith.extf %3 : vector<208x16xbf16> to vector<208x16xf32>
    %5 = vector.extract_strided_slice %4 {offsets = [0, 0], sizes = [128, 16], strides = [1, 1]} : vector<208x16xf32> to vector<128x16xf32>
    %6 = arith.truncf %5 : vector<128x16xf32> to vector<128x16xbf16>
    %c0_0 = arith.constant 0 : index
    %c0_1 = arith.constant 0 : index
    %c0_2 = arith.constant 0 : index
    %7 = vector.load %arg2[%c0_0, %c0_1, %c0_2] : memref<9x16x128xbf16, #tpu.memory_space<vmem>>, vector<1x16x128xbf16>
    %8 = vector.shape_cast %7 : vector<1x16x128xbf16> to vector<16x128xbf16>
    %cst = arith.constant dense<0.000000e+00> : vector<128x128xf32>
    %9 = tpu.matmul %6, %8, %cst {dimension_numbers = #tpu.dot_dimension_numbers<[1], [0], [0], [1], [0, 0, 1, 1], [], []>} : vector<128x16xbf16>, vector<16x128xbf16>, vector<128x128xf32> -> vector<128x128xf32>
    %10 = vector.extract_strided_slice %4 {offsets = [1, 0], sizes = [128, 16], strides = [1, 1]} : vector<208x16xf32> to vector<128x16xf32>
    %11 = arith.truncf %10 : vector<128x16xf32> to vector<128x16xbf16>
    %c1 = arith.constant 1 : index
    %c0_3 = arith.constant 0 : index
    %c0_4 = arith.constant 0 : index
    %12 = vector.load %arg2[%c1, %c0_3, %c0_4] : memref<9x16x128xbf16, #tpu.memory_space<vmem>>, vector<1x16x128xbf16>
    %13 = vector.shape_cast %12 : vector<1x16x128xbf16> to vector<16x128xbf16>
    %cst_5 = arith.constant dense<0.000000e+00> : vector<128x128xf32>
    %14 = tpu.matmul %11, %13, %cst_5 {dimension_numbers = #tpu.dot_dimension_numbers<[1], [0], [0], [1], [0, 0, 1, 1], [], []>} : vector<128x16xbf16>, vector<16x128xbf16>, vector<128x128xf32> -> vector<128x128xf32>
    %15 = arith.addf %9, %14 : vector<128x128xf32>
    %16 = vector.extract_strided_slice %4 {offsets = [2, 0], sizes = [128, 16], strides = [1, 1]} : vector<208x16xf32> to vector<128x16xf32>
    %17 = arith.truncf %16 : vector<128x16xf32> to vector<128x16xbf16>
    %c2 = arith.constant 2 : index
    %c0_6 = arith.constant 0 : index
    %c0_7 = arith.constant 0 : index
    %18 = vector.load %arg2[%c2, %c0_6, %c0_7] : memref<9x16x128xbf16, #tpu.memory_space<vmem>>, vector<1x16x128xbf16>
    %19 = vector.shape_cast %18 : vector<1x16x128xbf16> to vector<16x128xbf16>
    %cst_8 = arith.constant dense<0.000000e+00> : vector<128x128xf32>
    %20 = tpu.matmul %17, %19, %cst_8 {dimension_numbers = #tpu.dot_dimension_numbers<[1], [0], [0], [1], [0, 0, 1, 1], [], []>} : vector<128x16xbf16>, vector<16x128xbf16>, vector<128x128xf32> -> vector<128x128xf32>
    %21 = arith.addf %15, %20 : vector<128x128xf32>
    %22 = vector.extract_strided_slice %4 {offsets = [34, 0], sizes = [128, 16], strides = [1, 1]} : vector<208x16xf32> to vector<128x16xf32>
    %23 = arith.truncf %22 : vector<128x16xf32> to vector<128x16xbf16>
    %c3 = arith.constant 3 : index
    %c0_9 = arith.constant 0 : index
    %c0_10 = arith.constant 0 : index
    %24 = vector.load %arg2[%c3, %c0_9, %c0_10] : memref<9x16x128xbf16, #tpu.memory_space<vmem>>, vector<1x16x128xbf16>
    %25 = vector.shape_cast %24 : vector<1x16x128xbf16> to vector<16x128xbf16>
    %cst_11 = arith.constant dense<0.000000e+00> : vector<128x128xf32>
    %26 = tpu.matmul %23, %25, %cst_11 {dimension_numbers = #tpu.dot_dimension_numbers<[1], [0], [0], [1], [0, 0, 1, 1], [], []>} : vector<128x16xbf16>, vector<16x128xbf16>, vector<128x128xf32> -> vector<128x128xf32>
    %27 = arith.addf %21, %26 : vector<128x128xf32>
    %28 = vector.extract_strided_slice %4 {offsets = [35, 0], sizes = [128, 16], strides = [1, 1]} : vector<208x16xf32> to vector<128x16xf32>
    %29 = arith.truncf %28 : vector<128x16xf32> to vector<128x16xbf16>
    %c4 = arith.constant 4 : index
    %c0_12 = arith.constant 0 : index
    %c0_13 = arith.constant 0 : index
    %30 = vector.load %arg2[%c4, %c0_12, %c0_13] : memref<9x16x128xbf16, #tpu.memory_space<vmem>>, vector<1x16x128xbf16>
    %31 = vector.shape_cast %30 : vector<1x16x128xbf16> to vector<16x128xbf16>
    %cst_14 = arith.constant dense<0.000000e+00> : vector<128x128xf32>
    %32 = tpu.matmul %29, %31, %cst_14 {dimension_numbers = #tpu.dot_dimension_numbers<[1], [0], [0], [1], [0, 0, 1, 1], [], []>} : vector<128x16xbf16>, vector<16x128xbf16>, vector<128x128xf32> -> vector<128x128xf32>
    %33 = arith.addf %27, %32 : vector<128x128xf32>
    %34 = vector.extract_strided_slice %4 {offsets = [36, 0], sizes = [128, 16], strides = [1, 1]} : vector<208x16xf32> to vector<128x16xf32>
    %35 = arith.truncf %34 : vector<128x16xf32> to vector<128x16xbf16>
    %c5 = arith.constant 5 : index
    %c0_15 = arith.constant 0 : index
    %c0_16 = arith.constant 0 : index
    %36 = vector.load %arg2[%c5, %c0_15, %c0_16] : memref<9x16x128xbf16, #tpu.memory_space<vmem>>, vector<1x16x128xbf16>
    %37 = vector.shape_cast %36 : vector<1x16x128xbf16> to vector<16x128xbf16>
    %cst_17 = arith.constant dense<0.000000e+00> : vector<128x128xf32>
    %38 = tpu.matmul %35, %37, %cst_17 {dimension_numbers = #tpu.dot_dimension_numbers<[1], [0], [0], [1], [0, 0, 1, 1], [], []>} : vector<128x16xbf16>, vector<16x128xbf16>, vector<128x128xf32> -> vector<128x128xf32>
    %39 = arith.addf %33, %38 : vector<128x128xf32>
    %40 = vector.extract_strided_slice %4 {offsets = [68, 0], sizes = [128, 16], strides = [1, 1]} : vector<208x16xf32> to vector<128x16xf32>
    %41 = arith.truncf %40 : vector<128x16xf32> to vector<128x16xbf16>
    %c6 = arith.constant 6 : index
    %c0_18 = arith.constant 0 : index
    %c0_19 = arith.constant 0 : index
    %42 = vector.load %arg2[%c6, %c0_18, %c0_19] : memref<9x16x128xbf16, #tpu.memory_space<vmem>>, vector<1x16x128xbf16>
    %43 = vector.shape_cast %42 : vector<1x16x128xbf16> to vector<16x128xbf16>
    %cst_20 = arith.constant dense<0.000000e+00> : vector<128x128xf32>
    %44 = tpu.matmul %41, %43, %cst_20 {dimension_numbers = #tpu.dot_dimension_numbers<[1], [0], [0], [1], [0, 0, 1, 1], [], []>} : vector<128x16xbf16>, vector<16x128xbf16>, vector<128x128xf32> -> vector<128x128xf32>
    %45 = arith.addf %39, %44 : vector<128x128xf32>
    %46 = vector.extract_strided_slice %4 {offsets = [69, 0], sizes = [128, 16], strides = [1, 1]} : vector<208x16xf32> to vector<128x16xf32>
    %47 = arith.truncf %46 : vector<128x16xf32> to vector<128x16xbf16>
    %c7 = arith.constant 7 : index
    %c0_21 = arith.constant 0 : index
    %c0_22 = arith.constant 0 : index
    %48 = vector.load %arg2[%c7, %c0_21, %c0_22] : memref<9x16x128xbf16, #tpu.memory_space<vmem>>, vector<1x16x128xbf16>
    %49 = vector.shape_cast %48 : vector<1x16x128xbf16> to vector<16x128xbf16>
    %cst_23 = arith.constant dense<0.000000e+00> : vector<128x128xf32>
    %50 = tpu.matmul %47, %49, %cst_23 {dimension_numbers = #tpu.dot_dimension_numbers<[1], [0], [0], [1], [0, 0, 1, 1], [], []>} : vector<128x16xbf16>, vector<16x128xbf16>, vector<128x128xf32> -> vector<128x128xf32>
    %51 = arith.addf %45, %50 : vector<128x128xf32>
    %52 = vector.extract_strided_slice %4 {offsets = [70, 0], sizes = [128, 16], strides = [1, 1]} : vector<208x16xf32> to vector<128x16xf32>
    %53 = arith.truncf %52 : vector<128x16xf32> to vector<128x16xbf16>
    %c8 = arith.constant 8 : index
    %c0_24 = arith.constant 0 : index
    %c0_25 = arith.constant 0 : index
    %54 = vector.load %arg2[%c8, %c0_24, %c0_25] : memref<9x16x128xbf16, #tpu.memory_space<vmem>>, vector<1x16x128xbf16>
    %55 = vector.shape_cast %54 : vector<1x16x128xbf16> to vector<16x128xbf16>
    %cst_26 = arith.constant dense<0.000000e+00> : vector<128x128xf32>
    %56 = tpu.matmul %53, %55, %cst_26 {dimension_numbers = #tpu.dot_dimension_numbers<[1], [0], [0], [1], [0, 0, 1, 1], [], []>} : vector<128x16xbf16>, vector<16x128xbf16>, vector<128x128xf32> -> vector<128x128xf32>
    %57 = arith.addf %51, %56 : vector<128x128xf32>
    %c0_27 = arith.constant 0 : index
    %c0_28 = arith.constant 0 : index
    %58 = vector.load %arg3[%c0_27, %c0_28] : memref<1x128xf32, #tpu.memory_space<vmem>>, vector<1x128xf32>
    %59 = vector.broadcast %58 : vector<1x128xf32> to vector<128x128xf32>
    %60 = arith.addf %57, %59 : vector<128x128xf32>
    %cst_29 = arith.constant 0.000000e+00 : f32
    %61 = vector.broadcast %cst_29 : f32 to vector<128x128xf32>
    %62 = arith.maximumf %60, %61 : vector<128x128xf32>
    %c0_30 = arith.constant 0 : index
    %c0_31 = arith.constant 0 : index
    %63 = vector.load %arg4[%c0_30, %c0_31] : memref<128x128xf32, #tpu.memory_space<vmem>>, vector<128x128xf32>
    tpu.vector_store %arg4[%c0_30, %c0_31], %62 {strides = array<i32>} : memref<128x128xf32, #tpu.memory_space<vmem>>, vector<128x128xf32>,
    return
  }
  func.func @transform_0(%arg0: i32) -> (i32, i32) {
    %c0_i32 = arith.constant 0 : i32
    %c0_i32_0 = arith.constant 0 : i32
    %c0_i32_1 = arith.constant 0 : i32
    return %c0_i32, %c0_i32_0 : i32, i32
  }
  func.func @transform_1(%arg0: i32) -> (i32, i32, i32) {
    %c0_i32 = arith.constant 0 : i32
    %c0_i32_0 = arith.constant 0 : i32
    %c0_i32_1 = arith.constant 0 : i32
    %c0_i32_2 = arith.constant 0 : i32
    return %c0_i32, %c0_i32_0, %c0_i32_1 : i32, i32, i32
  }
  func.func @transform_2(%arg0: i32) -> (i32, i32) {
    %c0_i32 = arith.constant 0 : i32
    %c0_i32_0 = arith.constant 0 : i32
    %c0_i32_1 = arith.constant 0 : i32
    return %c0_i32, %c0_i32_0 : i32, i32
  }
  func.func @transform_3(%arg0: i32) -> (i32, i32) {
    %c0_i32 = arith.constant 0 : i32
    %c0_i32_0 = arith.constant 0 : i32
    return %arg0, %c0_i32 : i32, i32
  }
}

</mosaic_0001>

<bundles_post_ra>
// kernel: decoder_block_forward.2
= control target key start
LH: loop header
LB: loop body
LE: loop exit
PB: predicated region body
PF: predicated region fallthrough
CT: control target
= control target key end

     0   :  { %s2483_s12 = smov 0   ;;  %s3000_s0 = inlined_call_operand.vmem [shape: bf16[816,16], index: 0, kind: input, shape index: {}]   ;;  %s3001_s1 = inlined_call_operand.vmem [shape: bf16[9,16,128], index: 1, kind: input, shape index: {}]   ;;  %s3002_s2 = inlined_call_operand.vmem [shape: f32[1,128], index: 2, kind: input, shape index: {}]   ;;  %s3003_s3 = inlined_call_operand.vmem [shape: bf16[768,128], index: 3, kind: output, shape index: {}]  }
   0x1 LB: > { %s1852_s13 = sadd.s32 4294967295, %s2461_s12   ;;  %p1855_p0 = scmp.ge.s32.totalorder %s2461_s12, 1  ;;  %s2461_s12 = sphi %s2483_s12, %s13_s12  }
   0x2   : > { %p127_p1 = scmp.lt.s32.totalorder %s2461_s12, 7 }
   0x4   : > { %p128_p2 = pnand %p1855_p0, %p127_p1 }
   0x5   : > { %v2433_v0 = vld [vmem:[%s3001_s1 + $0x8] sm:$0xff] (!%p128_p2)   ;;  %s1858_s16 = sshll.u32 (!%p128_p2), %s1852_s13, 7  ;;  %v2499_v1 = vld [vmem:[%s3001_s1 + $0x20] sm:$0xff] (!%p128_p2)   ;;  %vm214_vm0 = vsmask.f32 (!%p128_p2), 7424  ;;  %vm289_vm2 = vcmask (!%p128_p2), 130048  }
   0x6   : > { %131 = sbr.rel (%p128_p2) target bundleno = 381 (0x17d), region = 32  ;;  %s154_s19 = sshra.s32 (!%p128_p2), %s1858_s16, 3  ;;  %2133 = vmatprep.subr.bf16.mxu1 (!%p128_p2), %v2433_v0  ;;  %2205 = vmatprep.subr.bf16.mxu0 (!%p128_p2), %v2499_v1  ;;  %v2437_v2 = vld [vmem:[%s3001_s1] sm:$0xff] (!%p128_p2)   ;;  %v2513_v3 = vld [vmem:[%s3001_s1 + $0x28] sm:$0xff] (!%p128_p2)   ;;  %vm842_vm1 = vsmask.f32 (!%p128_p2), 6400 }
   0x7   : > { %s1859_s20 = sshll.u32 (!%p128_p2), %s154_s19, 2  ;;  %2134 = vmatpush3.bf16.msra.mxu1 (!%p128_p2), %v2433_v0  ;;  %2206 = vmatpush3.bf16.msra.mxu0 (!%p128_p2), %v2499_v1  ;;  %v2591_v51 = vld [vmem:[%s3001_s1 + $0x30] sm:$0xff] (!%p128_p2)   ;;  %vm1034_vm3 = vcmask (!%p128_p2), 1045504   ;;  %vm542_vm4 = vcmask (!%p128_p2), 1046528   ;;  %vm1334_vm5 = vsmask.f32 (!%p128_p2), 5376 }
   0x8   : > { %s2505_s23 = scalar_lea.vmem (!%p128_p2), %s3000_s0, %s1859_s20  ;;  %2151 = vmatprep.subr.bf16.mxu1 (!%p128_p2), %v2437_v2  ;;  %2223 = vmatprep.subr.bf16.mxu0 (!%p128_p2), %v2513_v3  ;;  %v2607_v58 = vld [vmem:[%s3001_s1 + $0x10] sm:$0xff] (!%p128_p2)   ;;  %vm1526_vm6 = vcmask (!%p128_p2), 1044480   ;;  %s1856_s11 = sshll.u32 (!%p128_p2), %s1852_s13, 4 }
   0x9   : > { %v2517_v4 = vld [vmem:[%s2505_s23] sm:$0xff] (!%p128_p2)   ;;  %v2520_v5 = vld [vmem:[%s2505_s23 + $0x8] sm:$0xff] (!%p128_p2)   ;;  %v2524_v6 = vld [vmem:[%s2505_s23 + $0x10] sm:$0xff] (!%p128_p2)   ;;  %p147_p3 = scmp.lt.s32.totalorder (!%p128_p2), %s1856_s11, 95 }
   0xa   : > { %v216_v7 = vshrl.u32 (!%p128_p2), %v2517_v4, 16  ;;  %v218_v8 = vshll.u32 (!%p128_p2), %v2517_v4, 16  ;;  %v223_v9 = vshll.u32 (!%p128_p2), %v2520_v5, 16  ;;  %v227_v10 = vshrl.u32 (!%p128_p2), %v2520_v5, 16  ;;  %v2540_v20 = vld [vmem:[%s2505_s23 + $0x18] sm:$0xff] (!%p128_p2)   ;;  %v2543_v24 = vld [vmem:[%s2505_s23 + $0x20] sm:$0xff] (!%p128_p2)  }
   0xb   : > { %v2531_v11 = vshll.u32 (!%p128_p2), %v2524_v6, 16  ;;  %v2534_v12 = vshrl.u32 (!%p128_p2), %v2524_v6, 16  ;;  %v2546_v26 = vshll.u32 (!%p128_p2), %v2540_v20, 16  ;;  %v2549_v27 = vshrl.u32 (!%p128_p2), %v2540_v20, 16  ;;  %v2553_v29 = vld [vmem:[%s2505_s23 + $0x28] sm:$0xff] (!%p128_p2)   ;;  %v2569_v38 = vld [vmem:[%s2505_s23 + $0x30] sm:$0xff] (!%p128_p2)  }
   0xc   : > { %v220_v13 = vrot.slane (!%p128_p2), %v218_v8, 1  ;;  %v225_v14 = vrot.slane (!%p128_p2), %v223_v9, 1  ;;  %v843_v15 = vrot.slane (!%p128_p2), %v227_v10, 1  ;;  %v844_v16 = vrot.slane (!%p128_p2), %v223_v9, 2  ;;  %v2594_v52 = vld [vmem:[%s2505_s23 + $0x38] sm:$0xff] (!%p128_p2)  }
   0xd   : > { %v846_v17 = vrot.slane %v2534_v12, 1  ;;  %v847_v18 = vrot.slane %v2531_v11, 2  ;;  %v233_v19 = vrot.slane %v2531_v11, 1  ;;  %v2558_v32 = vshll.u32 %v2543_v24, 16  ;;  %v174_v53 = vld [vmem:[%s2505_s23 + $0x40] sm:$0xf] }
   0xe   : > { %v221_v21 = vor.u32 %v220_v13, %v216_v7  ;;  %v229_v22 = vor.u32 %v227_v10, %v225_v14  ;;  %v845_v23 = vor.u32 %v844_v16, %v843_v15  ;;  %v2561_v33 = vshrl.u32 %v2543_v24, 16  ;;  %s3005_s11 = smov (!%p147_p3, %s1856_s11), 95 }
   0xf   : > { %v848_v25 = vor.u32 %v847_v18, %v846_v17  ;;  %v237_v28 = vor.u32 %v2534_v12, %v233_v19  ;;  %v850_v35 = vrot.slane %v2549_v27, 1  ;;  %v851_v36 = vrot.slane %v2546_v26, 2  ;;  %s1857_s13 = sshll.u32 %s3005_s11, 2 }
  0x10   : > { %v226_v30 = vsel %vm214_vm0, %v221_v21, %v225_v14  ;;  %v234_v31 = vsel %vm214_vm0, %v229_v22, %v233_v19  ;;  %v241_v37 = vrot.slane %v2546_v26, 1  ;;  %v854_v39 = vrot.slane %v2561_v33, 1  ;;  %v175_v19 = vld [vmem:[%s2505_s23 + $0x44] sm:$0xf]  ;;  %s2975_s18 = scalar_lea.vmem %s3003_s3, %s1857_s13 }
  0x11   : > { %2135 = vmatprep.mubr.msk.bf16.mxu1 %vm289_vm2, %v226_v30  ;;  %v849_v34 = vsel %vm842_vm1, %v845_v23, %v848_v25  ;;  %v855_v40 = vrot.slane %v2558_v32, 2  ;;  %v249_v41 = vrot.slane %v2558_v32, 1  ;;  %v2577_v42 = vshll.u32 %v2553_v29, 16 }
  0x12   : > { %2207 = vmatprep.mubr.msk.bf16.mxu0 %vm289_vm2, %v849_v34  ;;  %2136 = vmatmul.mubr.msk.bf16.vlgmr.msra.gmra.mrb[0].mxu1 %vm289_vm2, %v234_v31  ;;  %v852_v43 = vor.u32 %v851_v36, %v850_v35  ;;  %v242_v44 = vsel %vm214_vm0, %v237_v28, %v241_v37  ;;  %v245_v45 = vor.u32 %v2549_v27, %v241_v37  ;;  %v2582_v46 = vshrl.u32 %v2553_v29, 16 }
  0x13   : > { %2152 = vmatpush3.bf16.msra.mxu1 %v2437_v2  ;;  %2139 = vmatprep.mubr.msk.bf16.mxu1 %vm289_vm2, %v242_v44  ;;  %v856_v47 = vor.u32 %v855_v40, %v854_v39  ;;  %v859_v48 = vrot.slane %v2577_v42, 2  ;;  %v253_v49 = vor.u32 %v2561_v33, %v249_v41  ;;  %v257_v50 = vrot.slane %v2577_v42, 1 }
  0x14   : > { %v853_v54 = vsel %vm842_vm1, %v848_v25, %v852_v43  ;;  %v858_v55 = vrot.slane %v2582_v46, 1  ;;  %v2602_v57 = vshll.u32 %v2569_v38, 16  ;;  %v250_v59 = vsel %vm214_vm0, %v245_v45, %v249_v41  ;;  %2169 = vmatprep.subr.bf16.mxu1 %v2607_v58 }
  0x15   : > { %2208 = vmatmul.mubr.msk.bf16.vlgmr.msra.gmra.mrb[0].mxu0 %vm289_vm2, %v853_v54  ;;  %v857_v56 = vsel %vm842_vm1, %v852_v43, %v856_v47  ;;  %v1035_v61 = vrot.slane %v2520_v5, 2  ;;  %v1036_v62 = vrot.slane %v2524_v6, 2  ;;  %v258_v63 = vsel %vm214_vm0, %v253_v49, %v257_v50 }
  0x16   : > { %2224 = vmatpush3.bf16.msra.mxu0 %v2513_v3  ;;  %2211 = vmatprep.mubr.msk.bf16.mxu0 %vm289_vm2, %v857_v56  ;;  %v2612_v60 = vor.u32 %v859_v48, %v858_v55  ;;  %v2619_v0 = vshrl.u32 %v2569_v38, 16  ;;  %v2622_v2 = vshll.u32 %v2594_v52, 16  ;;  %v2624_v3 = vcombine.low %v174_v53, %v174_v53 }
  0x17   : > { %2241 = vmatprep.subr.bf16.mxu0 %v2591_v51  ;;  %v261_v7 = vor.u32 %v2582_v46, %v257_v50  ;;  %v265_v8 = vrot.slane %v2602_v57, 1  ;;  %v2635_v13 = vshrl.u32 %v2594_v52, 16  ;;  %v1037_v15 = vsel %vm1034_vm3, %v1035_v61, %v1036_v62  ;;  %v2682_v50 = vld [vmem:[%s3001_s1 + $0x38] sm:$0xff]  }
  0x18   : > { %v861_v9 = vsel %vm842_vm1, %v856_v47, %v2612_v60  ;;  %v273_v10 = vrot.slane %v2622_v2, 1  ;;  %v279_v14 = vshll.u32 %v2624_v3, 16  ;;  %v1038_v16 = vrot.slane %v2540_v20, 2 }
  0x19   : > { %v269_v17 = vor.u32 %v2619_v0, %v265_v8  ;;  %v1040_v18 = vrot.slane %v2543_v24, 2  ;;  %v266_v21 = vsel %vm214_vm0, %v261_v7, %v265_v8  ;;  %v546_v25 = vrot.slane %v2524_v6, 1 }
  0x1a   : > { %2140 = vmatmul.mubr.msk.bf16.gmra.mrb[4].mxu1 %vm289_vm2, %v250_v59  ;;  %v277_v22 = vor.u32 %v2635_v13, %v273_v10  ;;  %v281_v23 = vrot.slane %v279_v14, 1  ;;  %v548_v28 = vrot.slane %v2540_v20, 1  ;;  %v2650_v30 = vsel %vm1034_vm3, %v1036_v62, %v1038_v16 }
  0x1b   : > { %2143 = vmatprep.mubr.msk.bf16.mxu1 %vm289_vm2, %v258_v63  ;;  %v274_v31 = vsel %vm214_vm0, %v269_v17, %v273_v10  ;;  %v2653_v34 = vcombine.low %v174_v53, %v175_v19  ;;  %v550_v35 = vrot.slane %v2543_v24, 1  ;;  %v2657_v36 = vsel %vm1034_vm3, %v1038_v16, %v1040_v18  ;;  %v176_v16 = vld [vmem:[%s2505_s23 + $0x48] sm:$0xf] }
  0x1c   : > { %v1042_v37 = vrot.slane %v2553_v29, 2  ;;  %v2663_v39 = vsel %vm542_vm4, %v546_v25, %v548_v28  ;;  %v552_v40 = vrot.slane %v2553_v29, 1  ;;  %v1044_v41 = vrot.slane %v2569_v38, 2 }
  0x1d   : > { %2212 = vmatmul.mubr.msk.bf16.gmra.mrb[4].mxu0 %vm289_vm2, %v861_v9  ;;  %v2669_v43 = vsel %vm542_vm4, %v548_v28, %v550_v35  ;;  %v1335_v44 = vrot.slane %v2534_v12, 2  ;;  %v1336_v45 = vrot.slane %v2531_v11, 3  ;;  %v282_v47 = vsel %vm214_vm0, %v277_v22, %v281_v23 }
  0x1e   : > { %2225 = vmatprep.mubr.msk.bf16.mxu0 %vm289_vm2, %v1037_v15  ;;  %v2676_v48 = vsel %vm542_vm4, %v550_v35, %v552_v40  ;;  %v1338_v49 = vrot.slane %v2549_v27, 2  ;;  %v1339_v12 = vrot.slane %v2546_v26, 3  ;;  %v554_v11 = vrot.slane %v2569_v38, 1 }
  0x1f   : > { %v1337_v53 = vor.u32 %v1336_v45, %v1335_v44  ;;  %v1342_v54 = vrot.slane %v2561_v33, 2  ;;  %v1343_v55 = vrot.slane %v2558_v32, 3  ;;  %v556_v56 = vrot.slane %v2594_v52, 1 }
  0x20   : > { %v1346_v59 = vrot.slane %v2582_v46, 2  ;;  %v1347_v27 = vrot.slane %v2577_v42, 3  ;;  %v1340_v61 = vor.u32 %v1339_v12, %v1338_v49  ;;  %v2694_v62 = vsel %vm542_vm4, %v552_v40, %v554_v11 }
  0x21   : > { %v558_v26 = vrot.slane %v2624_v3, 1  ;;  %v1350_v63 = vrot.slane %v2619_v0, 2  ;;  %v1344_v32 = vor.u32 %v1343_v55, %v1342_v54  ;;  %v2702_v33 = vsel %vm542_vm4, %v554_v11, %v556_v56 }
  0x22   : > { %2144 = vmatmul.mubr.msk.bf16.gmra.mrb[8].mxu1 %vm289_vm2, %v266_v21  ;;  %v1348_v42 = vor.u32 %v1347_v27, %v1346_v59  ;;  %v1351_v46 = vrot.slane %v2602_v57, 3  ;;  %v2707_v7 = vsel %vm1334_vm5, %v1337_v53, %v1340_v61  ;;  %v1355_v8 = vrot.slane %v2622_v2, 3 }
  0x23   : > { %2147 = vmatprep.mubr.msk.bf16.mxu1 %vm289_vm2, %v274_v31  ;;  %v2710_v3 = vsel %vm542_vm4, %v556_v56, %v558_v26  ;;  %v2715_v9 = vsel %vm1334_vm5, %v1340_v61, %v1344_v32  ;;  %v1046_v15 = vrot.slane %v2594_v52, 2  ;;  %v2726_v19 = vsel %vm1034_vm3, %v1040_v18, %v1042_v37  ;;  %v177_v18 = vld [vmem:[%s2505_s23 + $0x4c] sm:$0xf] }
  0x24   : > { %v2718_v10 = vsel %vm1334_vm5, %v1344_v32, %v1348_v42  ;;  %v1352_v14 = vor.u32 %v1351_v46, %v1350_v63  ;;  %v2731_v21 = vrot.slane %v2653_v34, 2  ;;  %v2737_v23 = vsel %vm1034_vm3, %v1042_v37, %v1044_v41 }
  0x25   : > { %2226 = vmatmul.mubr.msk.bf16.vlgmr.msra.gmra.mrb[0].mxu0 %vm289_vm2, %v2650_v30  ;;  %v1901_v31 = vcombine.low %v176_v16, %v176_v16  ;;  %v1527_v35 = vrot.slane %v2524_v6, 3  ;;  %v1528_v40 = vrot.slane %v2540_v20, 3  ;;  %v2749_v44 = vsel %vm1034_vm3, %v1044_v41, %v1046_v15  ;;  %v2766_v41 = vld [vmem:[%s3001_s1 + $0x18] sm:$0xff]  }
  0x26   : > { %2242 = vmatpush3.bf16.msra.mxu0 %v2591_v51  ;;  %2229 = vmatprep.mubr.msk.bf16.mxu0 %vm289_vm2, %v2657_v36  ;;  %v1354_v51 = vrot.slane %v2635_v13, 2  ;;  %v2734_v22 = vsel %vm1334_vm5, %v1348_v42, %v1352_v14  ;;  %v1530_v37 = vrot.slane %v2543_v24, 3  ;;  %v710_v45 = vrot.slane %v2653_v34, 1 }
  0x27   : > { %2259 = vmatprep.subr.bf16.mxu0 %v2682_v50  ;;  %v2760_v49 = vsel %vm1526_vm6, %v1527_v35, %v1528_v40  ;;  %v1532_v53 = vrot.slane %v2553_v29, 3  ;;  %v712_v12 = vrot.slane %v1901_v31, 1  ;;  %v2768_v11 = vcombine.low %v176_v16, %v177_v18 }
  0x28   : > { %v2723_v17 = vor.u32 %v1355_v8, %v1354_v51  ;;  %v871_v54 = vshrl.u32 %v2653_v34, 16  ;;  %v2772_v55 = vsel %vm1526_vm6, %v1528_v40, %v1530_v37  ;;  %v2775_v59 = vsel %vm542_vm4, %v556_v56, %v710_v45 }
  0x29   : > { %v874_v27 = vshll.u32 %v2653_v34, 16  ;;  %v2779_v61 = vsel %vm1526_vm6, %v1530_v37, %v1532_v53  ;;  %v2782_v26 = vsel %vm542_vm4, %v710_v45, %v712_v12  ;;  %v1534_v63 = vrot.slane %v2569_v38, 3 }
  0x2a   : > { %2148 = vmatmul.mubr.msk.bf16.gmra.mrb[12].mxu1 %vm289_vm2, %v282_v47  ;;  %v2741_v28 = vsel %vm1334_vm5, %v1352_v14, %v2723_v17  ;;  %v2757_v47 = vsel %vm1034_vm3, %v1046_v15, %v2731_v21  ;;  %v862_v32 = vrot.slane %v2619_v0, 1  ;;  %v863_v42 = vrot.slane %v2602_v57, 2  ;;  %v2803_v57 = vld [vmem:[%s2505_s23 + $0x50] ss:$0 sps:$4 sm:$0xff]  }
  0x2b   : > { %2153 = vmatprep.mubr.msk.bf16.mxu1 %vm289_vm2, %v2517_v4  ;;  %v1536_v56 = vrot.slane %v2594_v52, 3  ;;  %v866_v46 = vrot.slane %v2635_v13, 1  ;;  %v2795_v51 = vsel %vm1526_vm6, %v1532_v53, %v1534_v63  ;;  %v867_v8 = vrot.slane %v2622_v2, 2 }
  0x2c   : > { %v1538_v14 = vrot.slane %v2653_v34, 3  ;;  %v873_v0 = vrot.slane %v871_v54, 1  ;;  %v864_v13 = vor.u32 %v863_v42, %v862_v32  ;;  %v876_v15 = vrot.slane %v874_v27, 2 }
  0x2d   : > { %2230 = vmatmul.mubr.msk.bf16.gmra.mrb[4].mxu0 %vm289_vm2, %v2726_v19  ;;  %v1540_v16 = vrot.slane %v2768_v11, 3  ;;  %v868_v18 = vor.u32 %v867_v8, %v866_v46  ;;  %v880_v35 = vshrl.u32 %v1901_v31, 16  ;;  %v883_v40 = vshll.u32 %v1901_v31, 16 }
  0x2e   : > { %2233 = vmatprep.mubr.msk.bf16.mxu0 %vm289_vm2, %v2737_v23  ;;  %v2812_v2 = vsel %vm1526_vm6, %v1536_v56, %v1538_v14  ;;  %v2818_v37 = vsel %vm842_vm1, %v2612_v60, %v864_v13  ;;  %v877_v45 = vor.u32 %v876_v15, %v873_v0  ;;  %v1542_v12 = vrot.slane %v2803_v57, 3 }
  0x2f   : > { %v2821_v53 = vsel %vm1526_vm6, %v1538_v14, %v1540_v16  ;;  %v2827_v32 = vsel %vm842_vm1, %v864_v13, %v868_v18  ;;  %v882_v42 = vrot.slane %v880_v35, 1  ;;  %v544_v0 = vrot.slane %v2520_v5, 1 }
  0x30   : > { %v2830_v46 = vsel %vm842_vm1, %v868_v18, %v877_v45  ;;  %v2833_v60 = vsel %vm1526_vm6, %v1540_v16, %v1542_v12 }
  0x32   : > { %2154 = vmatmul.mubr.msk.bf16.vlgmr.msra.gmra.mrb[0].mxu1 %vm289_vm2, %v2520_v5  ;;  %v1202_v5 = vrot.slane %v2768_v11, 2 }
  0x33   : > { %2170 = vmatpush3.bf16.msra.mxu1 %v2607_v58  ;;  %2157 = vmatprep.mubr.msk.bf16.mxu1 %vm289_vm2, %v2524_v6  ;;  %v2806_v58 = vsel %vm1526_vm6, %v1534_v63, %v1536_v56  ;;  %v1050_v63 = vrot.slane %v1901_v31, 2  ;;  %v885_v56 = vrot.slane %v883_v40, 2  ;;  %v1204_v6 = vrot.slane %v2803_v57, 2 }
  0x34   : > { %2187 = vmatprep.subr.bf16.mxu1 %v2766_v41 }
  0x35   : > { %2234 = vmatmul.mubr.msk.bf16.gmra.mrb[8].mxu0 %vm289_vm2, %v2749_v44  ;;  %v886_v8 = vor.u32 %v885_v56, %v882_v42  ;;  %v1051_v14 = vsel %vm1034_vm3, %v2731_v21, %v1050_v63 }
  0x36   : > { %2237 = vmatprep.mubr.msk.bf16.mxu0 %vm289_vm2, %v2757_v47 }
  0x37   : > { %v2842_v31 = vsel %vm842_vm1, %v877_v45, %v886_v8 }
  0x3a   : > { %2158 = vmatmul.mubr.msk.bf16.gmra.mrb[4].mxu1 %vm289_vm2, %v2540_v20  ;;  %v543_v20 = vrot.slane %v2517_v4, 1  ;;  %v547_v4 = vsel %vm542_vm4, %v544_v0, %v546_v25  ;;  %v1363_v25 = vshrl.u32 %v2768_v11, 16 }
  0x3b   : > { %2161 = vmatprep.mubr.msk.bf16.mxu1 %vm289_vm2, %v2543_v24  ;;  %v2454_v24 = vld [vmem:[%s3001_s1 + $0x40] sm:$0xff]  }
  0x3d   : > { %2238 = vmatmul.mubr.msk.bf16.gmra.mrb[12].mxu0 %vm289_vm2, %v1051_v14 }
  0x3e   : > { %2243 = vmatprep.mubr.msk.bf16.mxu0 %vm289_vm2, %v2650_v30  ;;  %v1366_v30 = vshll.u32 %v2768_v11, 16  ;;  %v2966_v11 = vld [vmem:[%s3002_s2] ss:$0 sm:$0xff] }
  0x42   : > { %2162 = vmatmul.mubr.msk.bf16.gmra.mrb[8].mxu1 %vm289_vm2, %v2553_v29  ;;  %v545_v29 = vsel %vm542_vm4, %v543_v20, %v544_v0 }
  0x43   : > { %2165 = vmatprep.mubr.msk.bf16.mxu1 %vm289_vm2, %v2569_v38  ;;  %v1203_v38 = vsel %vm1034_vm3, %v2731_v21, %v1202_v5 }
  0x45   : > { %2244 = vmatmul.mubr.msk.bf16.vlgmr.msra.gmra.mrb[0].mxu0 %vm289_vm2, %v2657_v36  ;;  %v1358_v36 = vrot.slane %v871_v54, 2 }
  0x46   : > { %2260 = vmatpush3.bf16.msra.mxu0 %v2682_v50  ;;  %2247 = vmatprep.mubr.msk.bf16.mxu0 %vm289_vm2, %v2726_v19  ;;  %v1359_v50 = vrot.slane %v874_v27, 3  ;;  %v1372_v19 = vshrl.u32 %v2803_v57, 16 }
  0x47   : > { %2277 = vmatprep.subr.bf16.mxu0 %v2454_v24 }
  0x4a   : > { %2166 = vmatmul.mubr.msk.bf16.gmra.mrb[12].mxu1 %vm289_vm2, %v2594_v52  ;;  %v1205_v52 = vsel %vm1034_vm3, %v1202_v5, %v1204_v6 }
  0x4b   : > { %2171 = vmatprep.mubr.msk.bf16.mxu1 %vm289_vm2, %v545_v29 }
  0x4d   : > { %2248 = vmatmul.mubr.msk.bf16.gmra.mrb[4].mxu0 %vm289_vm2, %v2737_v23 }
  0x4e   : > { %2251 = vmatprep.mubr.msk.bf16.mxu0 %vm289_vm2, %v2749_v44 }
  0x52   : > { %2172 = vmatmul.mubr.msk.bf16.vlgmr.msra.gmra.mrb[0].mxu1 %vm289_vm2, %v547_v4 }
  0x53   : > { %2188 = vmatpush3.bf16.msra.mxu1 %v2766_v41  ;;  %2175 = vmatprep.mubr.msk.bf16.mxu1 %vm289_vm2, %v2663_v39 }
  0x54   : > { %2295 = vmatprep.subr.bf16.mxu1 %v2499_v1 }
  0x55   : > { %2252 = vmatmul.mubr.msk.bf16.gmra.mrb[8].mxu0 %vm289_vm2, %v2757_v47 }
  0x56   : > { %2255 = vmatprep.mubr.msk.bf16.mxu0 %vm289_vm2, %v1203_v38 }
  0x5a   : > { %2176 = vmatmul.mubr.msk.bf16.gmra.mrb[4].mxu1 %vm289_vm2, %v2669_v43 }
  0x5b   : > { %2179 = vmatprep.mubr.msk.bf16.mxu1 %vm289_vm2, %v2676_v48 }
  0x5d   : > { %2256 = vmatmul.mubr.msk.bf16.gmra.mrb[12].mxu0 %vm289_vm2, %v1205_v52 }
  0x5e   : > { %2261 = vmatprep.mubr.msk.bf16.mxu0 %vm289_vm2, %v2707_v7  ;;  %v1365_v7 = vrot.slane %v1363_v25, 2 }
  0x62   : > { %2180 = vmatmul.mubr.msk.bf16.gmra.mrb[8].mxu1 %vm289_vm2, %v2694_v62 }
  0x63   : > { %2183 = vmatprep.mubr.msk.bf16.mxu1 %vm289_vm2, %v2702_v33 }
  0x65   : > { %2262 = vmatmul.mubr.msk.bf16.vlgmr.msra.gmra.mrb[0].mxu0 %vm289_vm2, %v2715_v9  ;;  %v1368_v9 = vrot.slane %v1366_v30, 3 }
  0x66   : > { %2278 = vmatpush3.bf16.msra.mxu0 %v2454_v24  ;;  %2265 = vmatprep.mubr.msk.bf16.mxu0 %vm289_vm2, %v2718_v10  ;;  %v1360_v10 = vor.u32 %v1359_v50, %v1358_v36 }
  0x67   : > { %v1369_v21 = vor.u32 %v1368_v9, %v1365_v7 }
  0x68   : > { %v1361_v34 = vsel %vm1334_vm5, %v2723_v17, %v1360_v10 }
  0x6a   : > { %2184 = vmatmul.mubr.msk.bf16.gmra.mrb[12].mxu1 %vm289_vm2, %v2710_v3  ;;  %v1375_v3 = vshll.u32 %v2803_v57, 16 }
  0x6b   : > { %2189 = vmatprep.mubr.msk.bf16.mxu1 %vm289_vm2, %v547_v4 }
  0x6c   : > { %v1377_v23 = vrot.slane %v1375_v3, 3 }
  0x6d   : > { %2266 = vmatmul.mubr.msk.bf16.gmra.mrb[4].mxu0 %vm289_vm2, %v2734_v22  ;;  %v1374_v22 = vrot.slane %v1372_v19, 2 }
  0x6e   : > { %2269 = vmatprep.mubr.msk.bf16.mxu0 %vm289_vm2, %v2741_v28  ;;  %v1370_v28 = vsel %vm1334_vm5, %v1360_v10, %v1369_v21 }
  0x6f   : > { %v1378_v44 = vor.u32 %v1377_v23, %v1374_v22 }
  0x72   : > { %2190 = vmatmul.mubr.msk.bf16.vlgmr.msra.gmra.mrb[0].mxu1 %vm289_vm2, %v2663_v39 }
  0x73   : > { %2296 = vmatpush3.bf16.msra.mxu1 %v2499_v1  ;;  %2193 = vmatprep.mubr.msk.bf16.mxu1 %vm289_vm2, %v2669_v43  ;;  %v1379_v1 = vsel %vm1334_vm5, %v1369_v21, %v1378_v44 }
  0x75   : > { %2270 = vmatmul.mubr.msk.bf16.gmra.mrb[8].mxu0 %vm289_vm2, %v1361_v34 }
  0x76   : > { %2273 = vmatprep.mubr.msk.bf16.mxu0 %vm289_vm2, %v1370_v28 }
  0x7a   : > { %2194 = vmatmul.mubr.msk.bf16.gmra.mrb[4].mxu1 %vm289_vm2, %v2676_v48 }
  0x7b   : > { %2197 = vmatprep.mubr.msk.bf16.mxu1 %vm289_vm2, %v2694_v62 }
  0x7d   : > { %2274 = vmatmul.mubr.msk.bf16.gmra.mrb[12].mxu0 %vm289_vm2, %v1379_v1 }
  0x7e   : > { %2279 = vmatprep.mubr.msk.bf16.mxu0 %vm289_vm2, %v2760_v49 }
  0x82   : > { %2198 = vmatmul.mubr.msk.bf16.gmra.mrb[8].mxu1 %vm289_vm2, %v2702_v33 }
  0x83   : > { %2201 = vmatprep.mubr.msk.bf16.mxu1 %vm289_vm2, %v2775_v59 }
  0x85   : > { %2280 = vmatmul.mubr.msk.bf16.vlgmr.msra.gmra.mrb[0].mxu0 %vm289_vm2, %v2772_v55 }
  0x86   : > { %2283 = vmatprep.mubr.msk.bf16.mxu0 %vm289_vm2, %v2779_v61 }
  0x8a   : > { %2202 = vmatmul.mubr.msk.bf16.gmra.mrb[12].mxu1 %vm289_vm2, %v2782_v26 }
  0x8b   : > { %2215 = vmatprep.mubr.msk.bf16.mxu1 %vm289_vm2, %v2818_v37 }
  0x8d   : > { %2284 = vmatmul.mubr.msk.bf16.gmra.mrb[4].mxu0 %vm289_vm2, %v2795_v51 }
  0x8e   : > { %2287 = vmatprep.mubr.msk.bf16.mxu0 %vm289_vm2, %v2806_v58 }
  0x92   : > { %2216 = vmatmul.mubr.msk.bf16.vlgmr.msra.gmra.mrb[8].mxu1 %vm289_vm2, %v2827_v32 }
  0x93   : > { %2219 = vmatprep.mubr.msk.bf16.mxu1 %vm289_vm2, %v2830_v46 }
  0x95   : > { %2288 = vmatmul.mubr.msk.bf16.gmra.mrb[8].mxu0 %vm289_vm2, %v2812_v2 }
  0x96   : > { %2291 = vmatprep.mubr.msk.bf16.mxu0 %vm289_vm2, %v2821_v53 }
  0x9a   : > { %2220 = vmatmul.mubr.msk.bf16.gmra.mrb[12].mxu1 %vm289_vm2, %v2842_v31 }
  0x9d   : > { %2292 = vmatmul.mubr.msk.bf16.gmra.mrb[12].mxu0 %vm289_vm2, %v2833_v60 }
 0x145   : > { %v2191_v39 = vpop.f32.mrb[0].mxu1 }
 0x146   : > { %v760_v43 = vpop.f32.mrb[1].mxu1 }
 0x147   : > { %v2192_v48 = vpop.f32.mrb[2].mxu1 }
 0x148   : > { %v763_v62 = vpop.f32.mrb[3].mxu1 }
 0x14d   : > { %v2195_v33 = vpop.f32.mrb[4].mxu1 }
 0x14e   : > { %v776_v17 = vpop.f32.mrb[5].mxu1 }
 0x14f   : > { %v2196_v47 = vpop.f32.mrb[6].mxu1 }
 0x150   : > { %v779_v49 = vpop.f32.mrb[7].mxu1 }
 0x158   : > { %v2281_v41 = vpop.f32.mrb[0].mxu0 }
 0x159   : > { %v2297_v54 = vadd.f32 %v2281_v41, %v2191_v39  ;;  %v1608_v55 = vpop.f32.mrb[1].mxu0 }
 0x15a   : > { %v2298_v59 = vadd.f32 %v1608_v55, %v760_v43  ;;  %v2282_v27 = vpop.f32.mrb[2].mxu0 }
 0x15b   : > { %v1696_v61 = vadd.f32 %v2297_v54, %v2966_v11  ;;  %v2299_v26 = vadd.f32 %v2282_v27, %v2192_v48  ;;  %v1611_v51 = vpop.f32.mrb[3].mxu0 }
 0x15c   : > { %v1694_v57 = vadd.f32 %v2298_v59, %v2966_v11  ;;  %v2300_v13 = vadd.f32 %v1611_v51, %v763_v62 }
 0x15d   : > { %v1697_v58 = vadd.f32 %v2299_v26, %v2966_v11  ;;  %v1712_v16 = vmax.f32 %v1696_v61, 0.0 }
 0x15e   : > { %v1695_v15 = vadd.f32 %v2300_v13, %v2966_v11  ;;  %v1710_v2 = vmax.f32 %v1694_v57, 0.0 }
 0x15f   : > { %v1713_v18 = vmax.f32 %v1697_v58, 0.0 }
 0x160   : > { %v1711_v35 = vmax.f32 %v1695_v15, 0.0  ;;  %v2285_v40 = vpop.f32.mrb[4].mxu0 }
 0x161   : > { %v2013_v37 = vpack.c.bf16 %v1713_v18, %v1712_v16  ;;  %v2301_v45 = vadd.f32 %v2285_v40, %v2195_v33  ;;  %v1624_v53 = vpop.f32.mrb[5].mxu0 }
 0x162   : > { %v2008_v12 = vpack.c.bf16 %v1711_v35, %v1710_v2  ;;  %v2302_v63 = vadd.f32 %v1624_v53, %v776_v17  ;;  %v2286_v32 = vpop.f32.mrb[6].mxu0 }
 0x163   : > { %2045 = vst [vmem:[%s2975_s18 + $0x8] sm:$0xff] %v2013_v37   ;;  %v1700_v42 = vadd.f32 %v2301_v45, %v2966_v11  ;;  %v2303_v56 = vadd.f32 %v2286_v32, %v2196_v47  ;;  %v1627_v46 = vpop.f32.mrb[7].mxu0 }
 0x164   : > { %2009 = vst [vmem:[%s2975_s18] sm:$0xff] %v2008_v12   ;;  %v1698_v60 = vadd.f32 %v2302_v63, %v2966_v11  ;;  %v2304_v8 = vadd.f32 %v1627_v46, %v779_v49 }
 0x165   : > { %v2217_v14 = vpop.f32.mrb[8].mxu1  ;;  %v1701_v31 = vadd.f32 %v2303_v56, %v2966_v11  ;;  %v1716_v29 = vmax.f32 %v1700_v42, 0.0 }
 0x166   : > { %v984_v20 = vpop.f32.mrb[9].mxu1  ;;  %v1699_v0 = vadd.f32 %v2304_v8, %v2966_v11  ;;  %v1714_v38 = vmax.f32 %v1698_v60, 0.0 }
 0x167   : > { %v2218_v24 = vpop.f32.mrb[10].mxu1  ;;  %v1717_v4 = vmax.f32 %v1701_v31, 0.0 }
 0x168   : > { %v987_v5 = vpop.f32.mrb[11].mxu1  ;;  %v1715_v6 = vmax.f32 %v1699_v0, 0.0  ;;  %v2289_v52 = vpop.f32.mrb[8].mxu0 }
 0x169   : > { %v2023_v25 = vpack.c.bf16 %v1717_v4, %v1716_v29  ;;  %v2305_v30 = vadd.f32 %v2289_v52, %v2217_v14  ;;  %v1640_v36 = vpop.f32.mrb[9].mxu0 }
 0x16a   : > { %v2018_v50 = vpack.c.bf16 %v1715_v6, %v1714_v38  ;;  %v2306_v7 = vadd.f32 %v1640_v36, %v984_v20  ;;  %v2290_v9 = vpop.f32.mrb[10].mxu0 }
 0x16b   : > { %2047 = vst [vmem:[%s2975_s18 + $0x18] sm:$0xff] %v2023_v25   ;;  %v1704_v10 = vadd.f32 %v2305_v30, %v2966_v11  ;;  %v2307_v19 = vadd.f32 %v2290_v9, %v2218_v24  ;;  %v1643_v3 = vpop.f32.mrb[11].mxu0 }
 0x16c   : > { %2046 = vst [vmem:[%s2975_s18 + $0x10] sm:$0xff] %v2018_v50   ;;  %v1702_v21 = vadd.f32 %v2306_v7, %v2966_v11  ;;  %v2308_v34 = vadd.f32 %v1643_v3, %v987_v5 }
 0x16d   : > { %v2221_v22 = vpop.f32.mrb[12].mxu1  ;;  %v1705_v23 = vadd.f32 %v2307_v19, %v2966_v11  ;;  %v1720_v39 = vmax.f32 %v1704_v10, 0.0 }
 0x16e   : > { %v1000_v28 = vpop.f32.mrb[13].mxu1  ;;  %v1703_v44 = vadd.f32 %v2308_v34, %v2966_v11  ;;  %v1718_v62 = vmax.f32 %v1702_v21, 0.0 }
 0x16f   : > { %v2222_v1 = vpop.f32.mrb[14].mxu1  ;;  %v1721_v43 = vmax.f32 %v1705_v23, 0.0 }
 0x170   : > { %v1003_v48 = vpop.f32.mrb[15].mxu1  ;;  %v1719_v33 = vmax.f32 %v1703_v44, 0.0  ;;  %v2293_v17 = vpop.f32.mrb[12].mxu0 }
 0x171   : > { %v2033_v47 = vpack.c.bf16 %v1721_v43, %v1720_v39  ;;  %v2309_v49 = vadd.f32 %v2293_v17, %v2221_v22  ;;  %v1656_v41 = vpop.f32.mrb[13].mxu0 }
 0x172   : > { %v2028_v54 = vpack.c.bf16 %v1719_v33, %v1718_v62  ;;  %v2310_v55 = vadd.f32 %v1656_v41, %v1000_v28  ;;  %v2294_v59 = vpop.f32.mrb[14].mxu0 }
 0x173   : > { %2049 = vst [vmem:[%s2975_s18 + $0x28] sm:$0xff] %v2033_v47   ;;  %v1708_v27 = vadd.f32 %v2309_v49, %v2966_v11  ;;  %v2311_v61 = vadd.f32 %v2294_v59, %v2222_v1  ;;  %v1659_v26 = vpop.f32.mrb[15].mxu0 }
 0x174   : > { %2048 = vst [vmem:[%s2975_s18 + $0x20] sm:$0xff] %v2028_v54   ;;  %v1706_v51 = vadd.f32 %v2310_v55, %v2966_v11  ;;  %v2312_v57 = vadd.f32 %v1659_v26, %v1003_v48 }
 0x175   : > { %v1709_v13 = vadd.f32 %v2311_v61, %v2966_v11  ;;  %v1724_v15 = vmax.f32 %v1708_v27, 0.0 }
 0x176   : > { %v1707_v58 = vadd.f32 %v2312_v57, %v2966_v11  ;;  %v1722_v18 = vmax.f32 %v1706_v51, 0.0 }
 0x177   : > { %v1725_v16 = vmax.f32 %v1709_v13, 0.0 }
 0x178   : > { %v1723_v2 = vmax.f32 %v1707_v58, 0.0 }
 0x179   : > { %v2043_v35 = vpack.c.bf16 %v1725_v16, %v1724_v15 }
 0x17a   : > { %v2038_v40 = vpack.c.bf16 %v1723_v2, %v1722_v18 }
 0x17b   : > { %2051 = vst [vmem:[%s2975_s18 + $0x38] sm:$0xff] %v2043_v35  }
 0x17c   : > { %2050 = vst [vmem:[%s2975_s18 + $0x30] sm:$0xff] %v2038_v40  }
 0x17d PF: > { %s13_s12 = sadd.s32 1, %s2461_s12  }
 0x17e   : > { %p10_p4 = scmp.ge.s32.totalorder %s13_s12, 8  }
 0x180   :  { %12 = sbr.rel (!%p10_p4) target bundleno = 1 (0x1), region = 68 }

// kernel: decoder_block_forward.3
= control target key start
LH: loop header
LB: loop body
LE: loop exit
PB: predicated region body
PF: predicated region fallthrough
CT: control target
= control target key end

     0   :  { %s2376_s12 = smov 0   ;;  %s2899_s0 = inlined_call_operand.vmem [shape: bf16[2640,16], index: 0, kind: input, shape index: {}]   ;;  %s2900_s1 = inlined_call_operand.vmem [shape: bf16[9,16,128], index: 1, kind: input, shape index: {}]   ;;  %s2901_s2 = inlined_call_operand.vmem [shape: f32[1,128], index: 2, kind: input, shape index: {}]   ;;  %s2902_s3 = inlined_call_operand.vmem [shape: f32[2560,128], index: 3, kind: output, shape index: {}]  }
   0x1 LB: > { %s1820_s13 = sadd.s32 4294967295, %s2354_s12   ;;  %p1823_p0 = scmp.ge.s32.totalorder %s2354_s12, 1  ;;  %s2354_s12 = sphi %s2376_s12, %s13_s12  }
   0x2   : > { %p127_p1 = scmp.lt.s32.totalorder %s2354_s12, 21 }
   0x4   : > { %p128_p2 = pnand %p1823_p0, %p127_p1 }
   0x5   : > { %v2324_v0 = vld [vmem:[%s2900_s1 + $0x8] sm:$0xff] (!%p128_p2)   ;;  %s1826_s16 = sshll.u32 (!%p128_p2), %s1820_s13, 7  ;;  %v2392_v1 = vld [vmem:[%s2900_s1 + $0x20] sm:$0xff] (!%p128_p2)   ;;  %vm222_vm0 = vsmask.f32 (!%p128_p2), 7424  ;;  %vm297_vm2 = vcmask (!%p128_p2), 130048  }
   0x6   : > { %131 = sbr.rel (%p128_p2) target bundleno = 379 (0x17b), region = 32  ;;  %s154_s19 = sshra.s32 (!%p128_p2), %s1826_s16, 3  ;;  %2024 = vmatprep.subr.bf16.mxu1 (!%p128_p2), %v2324_v0  ;;  %2096 = vmatprep.subr.bf16.mxu0 (!%p128_p2), %v2392_v1  ;;  %v2328_v2 = vld [vmem:[%s2900_s1] sm:$0xff] (!%p128_p2)   ;;  %v2406_v3 = vld [vmem:[%s2900_s1 + $0x28] sm:$0xff] (!%p128_p2)   ;;  %vm857_vm1 = vsmask.f32 (!%p128_p2), 6400 }
   0x7   : > { %s1827_s20 = sshll.u32 (!%p128_p2), %s154_s19, 2  ;;  %2025 = vmatpush3.bf16.msra.mxu1 (!%p128_p2), %v2324_v0  ;;  %2097 = vmatpush3.bf16.msra.mxu0 (!%p128_p2), %v2392_v1  ;;  %v2462_v43 = vld [vmem:[%s2900_s1 + $0x10] sm:$0xff] (!%p128_p2)   ;;  %vm1054_vm3 = vcmask (!%p128_p2), 1045504   ;;  %vm550_vm4 = vcmask (!%p128_p2), 1046528   ;;  %vm1361_vm5 = vsmask.f32 (!%p128_p2), 5376 }
   0x8   : > { %s2398_s23 = scalar_lea.vmem (!%p128_p2), %s2899_s0, %s1827_s20  ;;  %2042 = vmatprep.subr.bf16.mxu1 (!%p128_p2), %v2328_v2  ;;  %2114 = vmatprep.subr.bf16.mxu0 (!%p128_p2), %v2406_v3  ;;  %v2473_v48 = vld [vmem:[%s2900_s1 + $0x30] sm:$0xff] (!%p128_p2)   ;;  %vm1558_vm6 = vcmask (!%p128_p2), 1044480   ;;  %s1824_s11 = sshll.u32 (!%p128_p2), %s1820_s13, 4 }
   0x9   : > { %v2410_v4 = vld [vmem:[%s2398_s23] sm:$0xff] (!%p128_p2)   ;;  %v2413_v5 = vld [vmem:[%s2398_s23 + $0x8] sm:$0xff] (!%p128_p2)   ;;  %v2421_v10 = vld [vmem:[%s2398_s23 + $0x10] sm:$0xff] (!%p128_p2)   ;;  %p147_p3 = scmp.lt.s32.totalorder (!%p128_p2), %s1824_s11, 319 }
   0xa   : > { %v224_v6 = vshrl.u32 (!%p128_p2), %v2410_v4, 16  ;;  %v226_v7 = vshll.u32 (!%p128_p2), %v2410_v4, 16  ;;  %v231_v8 = vshll.u32 (!%p128_p2), %v2413_v5, 16  ;;  %v235_v9 = vshrl.u32 (!%p128_p2), %v2413_v5, 16  ;;  %v2424_v11 = vld [vmem:[%s2398_s23 + $0x18] sm:$0xff] (!%p128_p2)   ;;  %v2431_v20 = vld [vmem:[%s2398_s23 + $0x20] sm:$0xff] (!%p128_p2)  }
   0xb   : > { %v239_v14 = vshll.u32 (!%p128_p2), %v2421_v10, 16  ;;  %v243_v15 = vshrl.u32 (!%p128_p2), %v2421_v10, 16  ;;  %v247_v16 = vshll.u32 (!%p128_p2), %v2424_v11, 16  ;;  %v251_v17 = vshrl.u32 (!%p128_p2), %v2424_v11, 16  ;;  %v2434_v25 = vld [vmem:[%s2398_s23 + $0x28] sm:$0xff] (!%p128_p2)   ;;  %v2444_v30 = vld [vmem:[%s2398_s23 + $0x30] sm:$0xff] (!%p128_p2)  }
   0xc   : > { %v228_v12 = vrot.slane (!%p128_p2), %v226_v7, 1  ;;  %v233_v13 = vrot.slane (!%p128_p2), %v231_v8, 1  ;;  %v2438_v28 = vshll.u32 (!%p128_p2), %v2431_v20, 16  ;;  %v2441_v29 = vshrl.u32 (!%p128_p2), %v2431_v20, 16  ;;  %v2482_v52 = vld [vmem:[%s2398_s23 + $0x38] sm:$0xff] (!%p128_p2)  }
   0xd   : > { %v858_v21 = vrot.slane %v243_v15, 1  ;;  %v859_v22 = vrot.slane %v239_v14, 2  ;;  %v861_v23 = vrot.slane %v251_v17, 1  ;;  %v862_v24 = vrot.slane %v247_v16, 2  ;;  %v174_v61 = vld [vmem:[%s2398_s23 + $0x40] sm:$0xf] }
   0xe   : > { %v229_v18 = vor.u32 %v228_v12, %v224_v6  ;;  %v237_v19 = vor.u32 %v235_v9, %v233_v13  ;;  %v241_v27 = vrot.slane %v239_v14, 1  ;;  %v249_v33 = vrot.slane %v247_v16, 1  ;;  %v175_v16 = vld [vmem:[%s2398_s23 + $0x44] sm:$0xf]  ;;  %s2906_s11 = smov (!%p147_p3, %s1824_s11), 319 }
   0xf   : > { %v860_v31 = vor.u32 %v859_v22, %v858_v21  ;;  %v863_v32 = vor.u32 %v862_v24, %v861_v23  ;;  %v2448_v34 = vshll.u32 %v2434_v25, 16  ;;  %v865_v36 = vrot.slane %v2441_v29, 1  ;;  %s1825_s16 = sshll.u32 %s2906_s11, 3 }
  0x10   : > { %v234_v26 = vsel %vm222_vm0, %v229_v18, %v233_v13  ;;  %v242_v35 = vsel %vm222_vm0, %v237_v19, %v241_v27  ;;  %v866_v37 = vrot.slane %v2438_v28, 2  ;;  %v245_v38 = vor.u32 %v243_v15, %v241_v27  ;;  %s2863_s18 = scalar_lea.vmem %s2902_s3, %s1825_s16 }
  0x11   : > { %2026 = vmatprep.mubr.msk.bf16.mxu1 %vm297_vm2, %v234_v26  ;;  %v864_v39 = vsel %vm857_vm1, %v860_v31, %v863_v32  ;;  %v2456_v40 = vshrl.u32 %v2434_v25, 16  ;;  %v870_v41 = vrot.slane %v2448_v34, 2  ;;  %v253_v42 = vor.u32 %v251_v17, %v249_v33 }
  0x12   : > { %2027 = vmatmul.mubr.msk.bf16.vlgmr.msra.gmra.mrb[0].mxu1 %vm297_vm2, %v242_v35  ;;  %2098 = vmatprep.mubr.msk.bf16.mxu0 %vm297_vm2, %v864_v39  ;;  %v867_v44 = vor.u32 %v866_v37, %v865_v36  ;;  %v250_v45 = vsel %vm222_vm0, %v245_v38, %v249_v33  ;;  %v257_v46 = vrot.slane %v2438_v28, 1  ;;  %v2468_v47 = vshll.u32 %v2444_v30, 16 }
  0x13   : > { %2043 = vmatpush3.bf16.msra.mxu1 %v2328_v2  ;;  %2030 = vmatprep.mubr.msk.bf16.mxu1 %vm297_vm2, %v250_v45  ;;  %v869_v49 = vrot.slane %v2456_v40, 1  ;;  %v2478_v50 = vshrl.u32 %v2444_v30, 16  ;;  %v265_v51 = vrot.slane %v2448_v34, 1  ;;  %v1055_v59 = vrot.slane %v2421_v10, 2 }
  0x14   : > { %2060 = vmatprep.subr.bf16.mxu1 %v2462_v43  ;;  %v868_v53 = vsel %vm857_vm1, %v863_v32, %v867_v44  ;;  %v874_v54 = vrot.slane %v2468_v47, 2  ;;  %v261_v55 = vor.u32 %v2441_v29, %v257_v46  ;;  %v258_v58 = vsel %vm222_vm0, %v253_v42, %v257_v46 }
  0x15   : > { %2099 = vmatmul.mubr.msk.bf16.vlgmr.msra.gmra.mrb[0].mxu0 %vm297_vm2, %v868_v53  ;;  %v871_v56 = vor.u32 %v870_v41, %v869_v49  ;;  %v873_v57 = vrot.slane %v2478_v50, 1  ;;  %v1056_v60 = vrot.slane %v2424_v11, 2  ;;  %v2501_v2 = vshll.u32 %v2482_v52, 16 }
  0x16   : > { %2115 = vmatpush3.bf16.msra.mxu0 %v2406_v3  ;;  %v266_v0 = vsel %vm222_vm0, %v261_v55, %v265_v51  ;;  %v273_v3 = vrot.slane %v2468_v47, 1  ;;  %v1836_v6 = vcombine.low %v174_v61, %v174_v61  ;;  %v269_v8 = vor.u32 %v2456_v40, %v265_v51  ;;  %v178_v55 = vld [vmem:[%s2398_s23 + $0x50] sm:$0xf] }
  0x17   : > { %v872_v62 = vsel %vm857_vm1, %v867_v44, %v871_v56  ;;  %v2496_v63 = vor.u32 %v874_v54, %v873_v57  ;;  %2132 = vmatprep.subr.bf16.mxu0 %v2473_v48  ;;  %v1057_v9 = vsel %vm1054_vm3, %v1055_v59, %v1056_v60  ;;  %v1058_v12 = vrot.slane %v2431_v20, 2  ;;  %v2554_v44 = vld [vmem:[%s2900_s1 + $0x38] sm:$0xff]  }
  0x18   : > { %2102 = vmatprep.mubr.msk.bf16.mxu0 %vm297_vm2, %v872_v62  ;;  %v277_v13 = vor.u32 %v2478_v50, %v273_v3  ;;  %v281_v14 = vrot.slane %v2501_v2, 1  ;;  %v1060_v15 = vrot.slane %v2434_v25, 2  ;;  %v2518_v17 = vshrl.u32 %v2482_v52, 16 }
  0x19   : > { %v876_v7 = vsel %vm857_vm1, %v871_v56, %v2496_v63  ;;  %v287_v18 = vshll.u32 %v1836_v6, 16  ;;  %v554_v19 = vrot.slane %v2421_v10, 1  ;;  %v556_v21 = vrot.slane %v2424_v11, 1 }
  0x1a   : > { %2031 = vmatmul.mubr.msk.bf16.gmra.mrb[4].mxu1 %vm297_vm2, %v258_v58  ;;  %v274_v22 = vsel %vm222_vm0, %v269_v8, %v273_v3  ;;  %v1059_v23 = vsel %vm1054_vm3, %v1056_v60, %v1058_v12  ;;  %v282_v24 = vsel %vm222_vm0, %v277_v13, %v281_v14  ;;  %v558_v27 = vrot.slane %v2431_v20, 1 }
  0x1b   : > { %2034 = vmatprep.mubr.msk.bf16.mxu1 %vm297_vm2, %v266_v0  ;;  %v2529_v26 = vsel %vm550_vm4, %v554_v19, %v556_v21  ;;  %v2533_v31 = vsel %vm1054_vm3, %v1058_v12, %v1060_v15  ;;  %v2535_v32 = vcombine.low %v174_v61, %v175_v16  ;;  %v560_v33 = vrot.slane %v2434_v25, 1  ;;  %v2589_v0 = vld [vmem:[%s2398_s23 + $0x48] sm:$0xff]   ;;  %v179_v12 = vld [vmem:[%s2398_s23 + $0x54] sm:$0xf] }
  0x1c   : > { %v1362_v35 = vrot.slane %v2441_v29, 2  ;;  %v285_v36 = vor.u32 %v2518_v17, %v281_v14  ;;  %v289_v37 = vrot.slane %v287_v18, 1  ;;  %v2542_v38 = vsel %vm550_vm4, %v556_v21, %v558_v27 }
  0x1d   : > { %2103 = vmatmul.mubr.msk.bf16.gmra.mrb[4].mxu0 %vm297_vm2, %v876_v7  ;;  %v1363_v39 = vrot.slane %v2438_v28, 3  ;;  %v2547_v41 = vsel %vm550_vm4, %v558_v27, %v560_v33  ;;  %v1365_v42 = vrot.slane %v2456_v40, 2  ;;  %v1366_v29 = vrot.slane %v2448_v34, 3  ;;  %v2629_v27 = vld [vmem:[%s2900_s1 + $0x18] sm:$0xff]  }
  0x1e   : > { %2116 = vmatprep.mubr.msk.bf16.mxu0 %vm297_vm2, %v1057_v9  ;;  %v562_v46 = vrot.slane %v2444_v30, 1  ;;  %v1369_v28 = vrot.slane %v2478_v50, 2  ;;  %v1370_v49 = vrot.slane %v2468_v47, 3  ;;  %v564_v53 = vrot.slane %v2482_v52, 1 }
  0x1f   : > { %v1364_v45 = vor.u32 %v1363_v39, %v1362_v35  ;;  %v1367_v51 = vor.u32 %v1366_v29, %v1365_v42  ;;  %v1373_v54 = vrot.slane %v2518_v17, 2  ;;  %v1374_v40 = vrot.slane %v2501_v2, 3 }
  0x20   : > { %v290_v34 = vsel %vm222_vm0, %v285_v36, %v289_v37  ;;  %v2566_v56 = vsel %vm550_vm4, %v560_v33, %v562_v46  ;;  %v1371_v57 = vor.u32 %v1370_v49, %v1369_v28  ;;  %v566_v50 = vrot.slane %v1836_v6, 1 }
  0x21   : > { %v1062_v47 = vrot.slane %v2444_v30, 2  ;;  %v2573_v58 = vsel %vm1361_vm5, %v1364_v45, %v1367_v51  ;;  %v2576_v59 = vsel %vm550_vm4, %v562_v46, %v564_v53  ;;  %v2578_v60 = vor.u32 %v1374_v40, %v1373_v54 }
  0x22   : > { %2035 = vmatmul.mubr.msk.bf16.gmra.mrb[8].mxu1 %vm297_vm2, %v274_v22  ;;  %v1064_v61 = vrot.slane %v2482_v52, 2  ;;  %v2586_v62 = vsel %vm550_vm4, %v564_v53, %v566_v50  ;;  %v2591_v3 = vcombine.low %v178_v55, %v178_v55  ;;  %v1066_v8 = vrot.slane %v2535_v32, 2 }
  0x23   : > { %2038 = vmatprep.mubr.msk.bf16.mxu1 %vm297_vm2, %v282_v24  ;;  %v2595_v6 = vsel %vm1361_vm5, %v1371_v57, %v2578_v60  ;;  %v2599_v7 = vsel %vm1054_vm3, %v1060_v15, %v1062_v47  ;;  %v2609_v13 = vrot.slane %v2589_v0, 2  ;;  %v882_v15 = vshrl.u32 %v2535_v32, 16 }
  0x24   : > { %v2605_v9 = vsel %vm1054_vm3, %v1062_v47, %v1064_v61  ;;  %v1070_v14 = vrot.slane %v2591_v3, 2  ;;  %v885_v16 = vshll.u32 %v2535_v32, 16  ;;  %v1559_v18 = vrot.slane %v2431_v20, 3 }
  0x25   : > { %2117 = vmatmul.mubr.msk.bf16.vlgmr.msra.gmra.mrb[0].mxu0 %vm297_vm2, %v1059_v23  ;;  %v2620_v21 = vsel %vm1054_vm3, %v1064_v61, %v1066_v8  ;;  %v2622_v22 = vcombine.low %v178_v55, %v179_v12  ;;  %v1560_v23 = vrot.slane %v2434_v25, 3  ;;  %v720_v24 = vrot.slane %v2535_v32, 1  ;;  %v2665_v55 = vld [vmem:[%s2398_s23 + $0x58] sm:$0xff]   ;;  %v2685_v12 = vld [vmem:[%s2398_s23 + $0x60] ss:$0 sps:$4 sm:$0xff]  }
  0x26   : > { %2133 = vmatpush3.bf16.msra.mxu0 %v2473_v48  ;;  %2120 = vmatprep.mubr.msk.bf16.mxu0 %vm297_vm2, %v2533_v31  ;;  %v2583_v48 = vsel %vm1361_vm5, %v1367_v51, %v1371_v57  ;;  %v884_v33 = vrot.slane %v882_v15, 1  ;;  %v887_v35 = vrot.slane %v885_v16, 2  ;;  %v1562_v36 = vrot.slane %v2444_v30, 3 }
  0x27   : > { %2150 = vmatprep.subr.bf16.mxu0 %v2554_v44  ;;  %v722_v37 = vrot.slane %v2589_v0, 1  ;;  %v1069_v39 = vsel %vm1054_vm3, %v1066_v8, %v2609_v13  ;;  %v891_v42 = vshrl.u32 %v2589_v0, 16  ;;  %v2641_v29 = vsel %vm1558_vm6, %v1559_v18, %v1560_v23 }
  0x28   : > { %v2644_v45 = vsel %vm550_vm4, %v564_v53, %v720_v24  ;;  %v2649_v46 = vsel %vm1558_vm6, %v1560_v23, %v1562_v36  ;;  %v1564_v49 = vrot.slane %v2482_v52, 3  ;;  %v724_v51 = vrot.slane %v2591_v3, 1 }
  0x29   : > { %v2652_v28 = vsel %vm550_vm4, %v720_v24, %v722_v37  ;;  %v2903_v53 = vshll.u32 %v2589_v0, 16  ;;  %v1566_v54 = vrot.slane %v2535_v32, 3  ;;  %v877_v40 = vrot.slane %v2518_v17, 1 }
  0x2a   : > { %2039 = vmatmul.mubr.msk.bf16.gmra.mrb[12].mxu1 %vm297_vm2, %v290_v34  ;;  %v878_v34 = vrot.slane %v2501_v2, 2  ;;  %v2668_v57 = vsel %vm1558_vm6, %v1562_v36, %v1564_v49  ;;  %v1568_v50 = vrot.slane %v2589_v0, 3  ;;  %v2674_v47 = vor.u32 %v887_v35, %v884_v33 }
  0x2b   : > { %2044 = vmatprep.mubr.msk.bf16.mxu1 %vm297_vm2, %v2410_v4  ;;  %v2677_v61 = vsel %vm1558_vm6, %v1564_v49, %v1566_v54  ;;  %v1570_v2 = vrot.slane %v2622_v22, 3  ;;  %v893_v8 = vrot.slane %v891_v42, 1  ;;  %v896_v23 = vrot.slane %v2903_v53, 2 }
  0x2c   : > { %v879_v17 = vor.u32 %v878_v34, %v877_v40  ;;  %v2688_v18 = vsel %vm1558_vm6, %v1566_v54, %v1568_v50  ;;  %v1572_v24 = vrot.slane %v2665_v55, 3  ;;  %v900_v33 = vshrl.u32 %v2591_v3, 16 }
  0x2d   : > { %2121 = vmatmul.mubr.msk.bf16.gmra.mrb[4].mxu0 %vm297_vm2, %v2599_v7  ;;  %v903_v49 = vshll.u32 %v2591_v3, 16  ;;  %v1574_v40 = vrot.slane %v2685_v12, 3  ;;  %v2711_v34 = vor.u32 %v896_v23, %v893_v8 }
  0x2e   : > { %2124 = vmatprep.mubr.msk.bf16.mxu0 %vm297_vm2, %v2605_v9  ;;  %v2697_v35 = vsel %vm857_vm1, %v2496_v63, %v879_v17  ;;  %v2701_v36 = vsel %vm857_vm1, %v879_v17, %v2674_v47  ;;  %v902_v54 = vrot.slane %v900_v33, 1 }
  0x2f   : > { %v905_v53 = vrot.slane %v903_v49, 2  ;;  %v2716_v63 = vsel %vm1558_vm6, %v1572_v24, %v1574_v40 }
  0x31   : > { %v906_v3 = vor.u32 %v905_v53, %v902_v54 }
  0x32   : > { %2045 = vmatmul.mubr.msk.bf16.vlgmr.msra.gmra.mrb[0].mxu1 %vm297_vm2, %v2413_v5 }
  0x33   : > { %2061 = vmatpush3.bf16.msra.mxu1 %v2462_v43  ;;  %2048 = vmatprep.mubr.msk.bf16.mxu1 %vm297_vm2, %v2421_v10  ;;  %v2671_v43 = vsel %vm550_vm4, %v722_v37, %v724_v51  ;;  %v2704_v37 = vsel %vm1558_vm6, %v1568_v50, %v1570_v2  ;;  %v2708_v51 = vsel %vm1558_vm6, %v1570_v2, %v1572_v24  ;;  %v1228_v10 = vrot.slane %v2685_v12, 2 }
  0x34   : > { %2078 = vmatprep.subr.bf16.mxu1 %v2629_v27  ;;  %v1071_v50 = vsel %vm1054_vm3, %v2609_v13, %v1070_v14  ;;  %v2724_v17 = vsel %vm857_vm1, %v2711_v34, %v906_v3  ;;  %v2347_v14 = vld [vmem:[%s2900_s1 + $0x40] sm:$0xff]   ;;  %v1404_v2 = vshrl.u32 %v2685_v12, 16 }
  0x35   : > { %2125 = vmatmul.mubr.msk.bf16.gmra.mrb[8].mxu0 %vm297_vm2, %v2620_v21 }
  0x36   : > { %2128 = vmatprep.mubr.msk.bf16.mxu0 %vm297_vm2, %v1069_v39 }
  0x3a   : > { %2049 = vmatmul.mubr.msk.bf16.gmra.mrb[4].mxu1 %vm297_vm2, %v2424_v11  ;;  %v551_v11 = vrot.slane %v2410_v4, 1 }
  0x3b   : > { %2052 = vmatprep.mubr.msk.bf16.mxu1 %vm297_vm2, %v2431_v20  ;;  %v552_v20 = vrot.slane %v2413_v5, 1  ;;  %v1224_v5 = vrot.slane %v2622_v22, 2 }
  0x3d   : > { %2129 = vmatmul.mubr.msk.bf16.gmra.mrb[12].mxu0 %vm297_vm2, %v1071_v50  ;;  %v555_v4 = vsel %vm550_vm4, %v552_v20, %v554_v19 }
  0x3e   : > { %2134 = vmatprep.mubr.msk.bf16.mxu0 %vm297_vm2, %v2533_v31 }
  0x42   : > { %2053 = vmatmul.mubr.msk.bf16.gmra.mrb[8].mxu1 %vm297_vm2, %v2434_v25  ;;  %v553_v25 = vsel %vm550_vm4, %v551_v11, %v552_v20 }
  0x43   : > { %2056 = vmatprep.mubr.msk.bf16.mxu1 %vm297_vm2, %v2444_v30  ;;  %v1226_v30 = vrot.slane %v2665_v55, 2 }
  0x45   : > { %2135 = vmatmul.mubr.msk.bf16.vlgmr.msra.gmra.mrb[0].mxu0 %vm297_vm2, %v2599_v7  ;;  %v1227_v31 = vsel %vm1054_vm3, %v1224_v5, %v1226_v30  ;;  %v1229_v19 = vsel %vm1054_vm3, %v1226_v30, %v1228_v10  ;;  %v1378_v7 = vrot.slane %v885_v16, 3  ;;  %v1395_v16 = vshrl.u32 %v2665_v55, 16 }
  0x46   : > { %2151 = vmatpush3.bf16.msra.mxu0 %v2554_v44  ;;  %2138 = vmatprep.mubr.msk.bf16.mxu0 %vm297_vm2, %v2605_v9  ;;  %v1377_v44 = vrot.slane %v882_v15, 2  ;;  %v1381_v9 = vrot.slane %v891_v42, 2  ;;  %v1389_v15 = vshll.u32 %v2622_v22, 16 }
  0x47   : > { %2168 = vmatprep.subr.bf16.mxu0 %v2347_v14  ;;  %v1397_v53 = vrot.slane %v1395_v16, 2 }
  0x4a   : > { %2057 = vmatmul.mubr.msk.bf16.gmra.mrb[12].mxu1 %vm297_vm2, %v2482_v52  ;;  %v1225_v52 = vsel %vm1054_vm3, %v2609_v13, %v1224_v5  ;;  %v2904_v13 = vshll.u32 %v2589_v0, 16 }
  0x4b   : > { %2062 = vmatprep.mubr.msk.bf16.mxu1 %vm297_vm2, %v553_v25 }
  0x4d   : > { %2139 = vmatmul.mubr.msk.bf16.gmra.mrb[4].mxu0 %vm297_vm2, %v2620_v21  ;;  %v1382_v21 = vrot.slane %v2904_v13, 3 }
  0x4e   : > { %2142 = vmatprep.mubr.msk.bf16.mxu0 %vm297_vm2, %v1069_v39  ;;  %v1398_v39 = vshll.u32 %v2665_v55, 16 }
  0x4f   : > { %v1383_v32 = vor.u32 %v1382_v21, %v1381_v9 }
  0x52   : > { %2063 = vmatmul.mubr.msk.bf16.vlgmr.msra.gmra.mrb[0].mxu1 %vm297_vm2, %v555_v4 }
  0x53   : > { %2079 = vmatpush3.bf16.msra.mxu1 %v2629_v27  ;;  %2066 = vmatprep.mubr.msk.bf16.mxu1 %vm297_vm2, %v2529_v26  ;;  %v1386_v27 = vshrl.u32 %v2622_v22, 16  ;;  %v1400_v22 = vrot.slane %v1398_v39, 3 }
  0x54   : > { %2186 = vmatprep.subr.bf16.mxu1 %v2392_v1 }
  0x55   : > { %2143 = vmatmul.mubr.msk.bf16.gmra.mrb[8].mxu0 %vm297_vm2, %v1225_v52  ;;  %v1388_v0 = vrot.slane %v1386_v27, 2  ;;  %v1401_v8 = vor.u32 %v1400_v22, %v1397_v53 }
  0x56   : > { %2146 = vmatprep.mubr.msk.bf16.mxu0 %vm297_vm2, %v1227_v31 }
  0x5a   : > { %2067 = vmatmul.mubr.msk.bf16.gmra.mrb[4].mxu1 %vm297_vm2, %v2542_v38 }
  0x5b   : > { %2070 = vmatprep.mubr.msk.bf16.mxu1 %vm297_vm2, %v2547_v41 }
  0x5d   : > { %2147 = vmatmul.mubr.msk.bf16.gmra.mrb[12].mxu0 %vm297_vm2, %v1229_v19 }
  0x5e   : > { %2152 = vmatprep.mubr.msk.bf16.mxu0 %vm297_vm2, %v2573_v58  ;;  %v1379_v58 = vor.u32 %v1378_v7, %v1377_v44 }
  0x60   : > { %v1384_v42 = vsel %vm1361_vm5, %v1379_v58, %v1383_v32 }
  0x62   : > { %2071 = vmatmul.mubr.msk.bf16.gmra.mrb[8].mxu1 %vm297_vm2, %v2566_v56 }
  0x63   : > { %2074 = vmatprep.mubr.msk.bf16.mxu1 %vm297_vm2, %v2576_v59 }
  0x65   : > { %2153 = vmatmul.mubr.msk.bf16.vlgmr.msra.gmra.mrb[0].mxu0 %vm297_vm2, %v2583_v48  ;;  %v1380_v48 = vsel %vm1361_vm5, %v2578_v60, %v1379_v58  ;;  %v1406_v60 = vrot.slane %v1404_v2, 2 }
  0x66   : > { %2169 = vmatpush3.bf16.msra.mxu0 %v2347_v14  ;;  %2156 = vmatprep.mubr.msk.bf16.mxu0 %vm297_vm2, %v2595_v6  ;;  %v1391_v6 = vrot.slane %v1389_v15, 3 }
  0x68   : > { %v1392_v55 = vor.u32 %v1391_v6, %v1388_v0 }
  0x6a   : > { %2075 = vmatmul.mubr.msk.bf16.gmra.mrb[12].mxu1 %vm297_vm2, %v2586_v62  ;;  %v1407_v62 = vshll.u32 %v2685_v12, 16  ;;  %v1402_v24 = vsel %vm1361_vm5, %v1392_v55, %v1401_v8 }
  0x6b   : > { %2080 = vmatprep.mubr.msk.bf16.mxu1 %vm297_vm2, %v2529_v26  ;;  %v1393_v26 = vsel %vm1361_vm5, %v1383_v32, %v1392_v55 }
  0x6c   : > { %v1409_v23 = vrot.slane %v1407_v62, 3 }
  0x6d   : > { %2157 = vmatmul.mubr.msk.bf16.gmra.mrb[4].mxu0 %vm297_vm2, %v1380_v48 }
  0x6e   : > { %2160 = vmatprep.mubr.msk.bf16.mxu0 %vm297_vm2, %v1384_v42  ;;  %v1410_v12 = vor.u32 %v1409_v23, %v1406_v60 }
  0x72   : > { %2081 = vmatmul.mubr.msk.bf16.vlgmr.msra.gmra.mrb[0].mxu1 %vm297_vm2, %v2542_v38  ;;  %v1411_v38 = vsel %vm1361_vm5, %v1401_v8, %v1410_v12 }
  0x73   : > { %2187 = vmatpush3.bf16.msra.mxu1 %v2392_v1  ;;  %2084 = vmatprep.mubr.msk.bf16.mxu1 %vm297_vm2, %v2547_v41  ;;  %v898_v1 = vsel %vm857_vm1, %v2674_v47, %v2711_v34  ;;  %v2857_v47 = vld [vmem:[%s2901_s2] ss:$0 sm:$0xff] }
  0x75   : > { %2161 = vmatmul.mubr.msk.bf16.gmra.mrb[8].mxu0 %vm297_vm2, %v1393_v26 }
  0x76   : > { %2164 = vmatprep.mubr.msk.bf16.mxu0 %vm297_vm2, %v1402_v24 }
  0x7a   : > { %2085 = vmatmul.mubr.msk.bf16.gmra.mrb[4].mxu1 %vm297_vm2, %v2566_v56 }
  0x7b   : > { %2088 = vmatprep.mubr.msk.bf16.mxu1 %vm297_vm2, %v2576_v59 }
  0x7d   : > { %2165 = vmatmul.mubr.msk.bf16.gmra.mrb[12].mxu0 %vm297_vm2, %v1411_v38 }
  0x7e   : > { %2170 = vmatprep.mubr.msk.bf16.mxu0 %vm297_vm2, %v2641_v29 }
  0x82   : > { %2089 = vmatmul.mubr.msk.bf16.gmra.mrb[8].mxu1 %vm297_vm2, %v2644_v45 }
  0x83   : > { %2092 = vmatprep.mubr.msk.bf16.mxu1 %vm297_vm2, %v2652_v28 }
  0x85   : > { %2171 = vmatmul.mubr.msk.bf16.vlgmr.msra.gmra.mrb[0].mxu0 %vm297_vm2, %v2649_v46 }
  0x86   : > { %2174 = vmatprep.mubr.msk.bf16.mxu0 %vm297_vm2, %v2668_v57 }
  0x8a   : > { %2093 = vmatmul.mubr.msk.bf16.gmra.mrb[12].mxu1 %vm297_vm2, %v2671_v43 }
  0x8b   : > { %2106 = vmatprep.mubr.msk.bf16.mxu1 %vm297_vm2, %v2697_v35 }
  0x8d   : > { %2175 = vmatmul.mubr.msk.bf16.gmra.mrb[4].mxu0 %vm297_vm2, %v2677_v61 }
  0x8e   : > { %2178 = vmatprep.mubr.msk.bf16.mxu0 %vm297_vm2, %v2688_v18 }
  0x92   : > { %2107 = vmatmul.mubr.msk.bf16.vlgmr.msra.gmra.mrb[8].mxu1 %vm297_vm2, %v2701_v36 }
  0x93   : > { %2110 = vmatprep.mubr.msk.bf16.mxu1 %vm297_vm2, %v898_v1 }
  0x95   : > { %2179 = vmatmul.mubr.msk.bf16.gmra.mrb[8].mxu0 %vm297_vm2, %v2704_v37 }
  0x96   : > { %2182 = vmatprep.mubr.msk.bf16.mxu0 %vm297_vm2, %v2708_v51 }
  0x9a   : > { %2111 = vmatmul.mubr.msk.bf16.gmra.mrb[12].mxu1 %vm297_vm2, %v2724_v17 }
  0x9d   : > { %2183 = vmatmul.mubr.msk.bf16.gmra.mrb[12].mxu0 %vm297_vm2, %v2716_v63 }
 0x145   : > { %v2082_v41 = vpop.f32.mrb[0].mxu1 }
 0x146   : > { %v775_v56 = vpop.f32.mrb[1].mxu1 }
 0x147   : > { %v2083_v59 = vpop.f32.mrb[2].mxu1 }
 0x148   : > { %v778_v29 = vpop.f32.mrb[3].mxu1 }
 0x14d   : > { %v2086_v45 = vpop.f32.mrb[4].mxu1 }
 0x14e   : > { %v791_v46 = vpop.f32.mrb[5].mxu1 }
 0x14f   : > { %v2087_v28 = vpop.f32.mrb[6].mxu1 }
 0x150   : > { %v794_v57 = vpop.f32.mrb[7].mxu1 }
 0x158   : > { %v2172_v43 = vpop.f32.mrb[0].mxu0 }
 0x159   : > { %v2188_v61 = vadd.f32 %v2172_v43, %v2082_v41  ;;  %v1640_v18 = vpop.f32.mrb[1].mxu0 }
 0x15a   : > { %v2189_v33 = vadd.f32 %v1640_v18, %v775_v56  ;;  %v2173_v35 = vpop.f32.mrb[2].mxu0 }
 0x15b   : > { %v1728_v36 = vadd.f32 %v2188_v61, %v2857_v47  ;;  %v2190_v37 = vadd.f32 %v2173_v35, %v2083_v59  ;;  %v1643_v49 = vpop.f32.mrb[3].mxu0 }
 0x15c   : > { %v1726_v51 = vadd.f32 %v2189_v33, %v2857_v47  ;;  %v2191_v54 = vadd.f32 %v1643_v49, %v778_v29 }
 0x15d   : > { %v1744_v40 = vmax.f32 %v1728_v36, 0.0  ;;  %v1729_v34 = vadd.f32 %v2190_v37, %v2857_v47 }
 0x15e   : > { %v1742_v63 = vmax.f32 %v1726_v51, 0.0  ;;  %v1727_v50 = vadd.f32 %v2191_v54, %v2857_v47 }
 0x15f   : > { %1760 = vst [vmem:[%s2863_s18 + $0x10] sm:$0xff] %v1744_v40  ;;  %v1745_v3 = vmax.f32 %v1729_v34, 0.0 }
 0x160   : > { %1758 = vst [vmem:[%s2863_s18] sm:$0xff] %v1742_v63  ;;  %v1743_v17 = vmax.f32 %v1727_v50, 0.0  ;;  %v2176_v11 = vpop.f32.mrb[4].mxu0 }
 0x161   : > { %1761 = vst [vmem:[%s2863_s18 + $0x18] sm:$0xff] %v1745_v3  ;;  %v2192_v20 = vadd.f32 %v2176_v11, %v2086_v45  ;;  %v1656_v14 = vpop.f32.mrb[5].mxu0 }
 0x162   : > { %1759 = vst [vmem:[%s2863_s18 + $0x8] sm:$0xff] %v1743_v17  ;;  %v2193_v25 = vadd.f32 %v1656_v14, %v791_v46  ;;  %v2177_v4 = vpop.f32.mrb[6].mxu0 }
 0x163   : > { %v1732_v5 = vadd.f32 %v2192_v20, %v2857_v47  ;;  %v2194_v30 = vadd.f32 %v2177_v4, %v2087_v28  ;;  %v1659_v52 = vpop.f32.mrb[7].mxu0 }
 0x164   : > { %v1730_v31 = vadd.f32 %v2193_v25, %v2857_v47  ;;  %v2195_v10 = vadd.f32 %v1659_v52, %v794_v57 }
 0x165   : > { %v2108_v19 = vpop.f32.mrb[8].mxu1  ;;  %v1748_v44 = vmax.f32 %v1732_v5, 0.0  ;;  %v1733_v7 = vadd.f32 %v2194_v30, %v2857_v47 }
 0x166   : > { %v1004_v9 = vpop.f32.mrb[9].mxu1  ;;  %v1746_v13 = vmax.f32 %v1730_v31, 0.0  ;;  %v1731_v21 = vadd.f32 %v2195_v10, %v2857_v47 }
 0x167   : > { %v2109_v58 = vpop.f32.mrb[10].mxu1  ;;  %1764 = vst [vmem:[%s2863_s18 + $0x30] sm:$0xff] %v1748_v44  ;;  %v1749_v27 = vmax.f32 %v1733_v7, 0.0 }
 0x168   : > { %v1007_v15 = vpop.f32.mrb[11].mxu1  ;;  %1762 = vst [vmem:[%s2863_s18 + $0x20] sm:$0xff] %v1746_v13  ;;  %v1747_v32 = vmax.f32 %v1731_v21, 0.0  ;;  %v2180_v16 = vpop.f32.mrb[8].mxu0 }
 0x169   : > { %1765 = vst [vmem:[%s2863_s18 + $0x38] sm:$0xff] %v1749_v27  ;;  %v2196_v39 = vadd.f32 %v2180_v16, %v2108_v19  ;;  %v1672_v48 = vpop.f32.mrb[9].mxu0 }
 0x16a   : > { %1763 = vst [vmem:[%s2863_s18 + $0x28] sm:$0xff] %v1747_v32  ;;  %v2197_v0 = vadd.f32 %v1672_v48, %v1004_v9  ;;  %v2181_v6 = vpop.f32.mrb[10].mxu0 }
 0x16b   : > { %v1736_v42 = vadd.f32 %v2196_v39, %v2857_v47  ;;  %v2198_v53 = vadd.f32 %v2181_v6, %v2109_v58  ;;  %v1675_v22 = vpop.f32.mrb[11].mxu0 }
 0x16c   : > { %v1734_v55 = vadd.f32 %v2197_v0, %v2857_v47  ;;  %v2199_v2 = vadd.f32 %v1675_v22, %v1007_v15 }
 0x16d   : > { %v2112_v62 = vpop.f32.mrb[12].mxu1  ;;  %v1752_v8 = vmax.f32 %v1736_v42, 0.0  ;;  %v1737_v26 = vadd.f32 %v2198_v53, %v2857_v47 }
 0x16e   : > { %v1020_v60 = vpop.f32.mrb[13].mxu1  ;;  %v1750_v23 = vmax.f32 %v1734_v55, 0.0  ;;  %v1735_v24 = vadd.f32 %v2199_v2, %v2857_v47 }
 0x16f   : > { %v2113_v12 = vpop.f32.mrb[14].mxu1  ;;  %1768 = vst [vmem:[%s2863_s18 + $0x50] sm:$0xff] %v1752_v8  ;;  %v1753_v38 = vmax.f32 %v1737_v26, 0.0 }
 0x170   : > { %v1023_v1 = vpop.f32.mrb[15].mxu1  ;;  %1766 = vst [vmem:[%s2863_s18 + $0x40] sm:$0xff] %v1750_v23  ;;  %v1751_v41 = vmax.f32 %v1735_v24, 0.0  ;;  %v2184_v56 = vpop.f32.mrb[12].mxu0 }
 0x171   : > { %1769 = vst [vmem:[%s2863_s18 + $0x58] sm:$0xff] %v1753_v38  ;;  %v2200_v59 = vadd.f32 %v2184_v56, %v2112_v62  ;;  %v1688_v29 = vpop.f32.mrb[13].mxu0 }
 0x172   : > { %1767 = vst [vmem:[%s2863_s18 + $0x48] sm:$0xff] %v1751_v41  ;;  %v2201_v45 = vadd.f32 %v1688_v29, %v1020_v60  ;;  %v2185_v46 = vpop.f32.mrb[14].mxu0 }
 0x173   : > { %v1740_v28 = vadd.f32 %v2200_v59, %v2857_v47  ;;  %v2202_v57 = vadd.f32 %v2185_v46, %v2113_v12  ;;  %v1691_v43 = vpop.f32.mrb[15].mxu0 }
 0x174   : > { %v1738_v61 = vadd.f32 %v2201_v45, %v2857_v47  ;;  %v2203_v18 = vadd.f32 %v1691_v43, %v1023_v1 }
 0x175   : > { %v1756_v33 = vmax.f32 %v1740_v28, 0.0  ;;  %v1741_v35 = vadd.f32 %v2202_v57, %v2857_v47 }
 0x176   : > { %v1754_v36 = vmax.f32 %v1738_v61, 0.0  ;;  %v1739_v37 = vadd.f32 %v2203_v18, %v2857_v47 }
 0x177   : > { %1772 = vst [vmem:[%s2863_s18 + $0x70] sm:$0xff] %v1756_v33  ;;  %v1757_v49 = vmax.f32 %v1741_v35, 0.0 }
 0x178   : > { %1770 = vst [vmem:[%s2863_s18 + $0x60] sm:$0xff] %v1754_v36  ;;  %v1755_v51 = vmax.f32 %v1739_v37, 0.0 }
 0x179   : > { %1773 = vst [vmem:[%s2863_s18 + $0x78] sm:$0xff] %v1757_v49 }
 0x17a   : > { %1771 = vst [vmem:[%s2863_s18 + $0x68] sm:$0xff] %v1755_v51 }
 0x17b PF: > { %s13_s12 = sadd.s32 1, %s2354_s12  }
 0x17c   : > { %p10_p4 = scmp.ge.s32.totalorder %s13_s12, 22  }
 0x17e   :  { %12 = sbr.rel (!%p10_p4) target bundleno = 1 (0x1), region = 68 }

</bundles_post_ra>
